<compile_context>
chip_gen: v5e
topology: v5e:2x2
jax: 0.10.0
libtpu: 0.0.40
codegen_flags: <defaults>
</compile_context>

<pallas_src>
import functools

import jax
import jax.numpy as jnp
from jax.experimental import pallas as pl
from jax.experimental.pallas import tpu as pltpu

LANE = 128


def _round_up(x, m):
    return (x + m - 1) // m * m


def _vae_head_kernel(rep_ref, eps_ref, a_ref,
                     w_ml_ref, b_ml_ref, w_y_ref, w_a_ref, b_y_ref,
                     ml_ref, y_ref, *, lp):
    # Encoder latent heads: one MXU dot produces [mu | logvar], N = 2*lp = 256.
    ml = jnp.dot(rep_ref[...], w_ml_ref[...],
                 preferred_element_type=jnp.float32) + b_ml_ref[...]
    mu = ml[:, :lp]
    logvar = ml[:, lp:]

    # Reparametrize: z = mu + exp(0.5 * logvar) * eps  (eps uniform, like torch.rand_like).
    z = mu + jnp.exp(0.5 * logvar) * eps_ref[...]

    # Decoder + FairDecoder heads packed into one lane-dense (TILE_B, 128) block:
    #   col 0 = yhat, col 1 = yhat_fair.  The sensitive attribute 'a' is added as a
    #   VPU rank-1 update so the contraction dim stays lane aligned at lp.
    y = jnp.dot(z, w_y_ref[...], preferred_element_type=jnp.float32)
    y = y + a_ref[...] * w_a_ref[...] + b_y_ref[...]

    ml_ref[...] = ml.astype(ml_ref.dtype)
    y_ref[...] = y.astype(y_ref.dtype)


def pack_params(w_mu, b_mu, w_lv, b_lv, w_dec, b_dec, w_fair, b_fair):
    """Pack PyTorch-layout linear params into lane-aligned fused matrices.

    w_mu, w_lv : (L, F)   torch nn.Linear weight layout (out, in)
    b_mu, b_lv : (L,)
    w_dec      : (1, L),  b_dec : (1,)
    w_fair     : (1, L+1) (weight over [z, a]),  b_fair : (1,)
    """
    L, F = w_mu.shape
    LP = _round_up(L, LANE)

    w_ml = jnp.zeros((F, 2 * LP), jnp.float32)
    w_ml = w_ml.at[:, :L].set(w_mu.T)
    w_ml = w_ml.at[:, LP:LP + L].set(w_lv.T)
    b_ml = jnp.zeros((1, 2 * LP), jnp.float32)
    b_ml = b_ml.at[0, :L].set(b_mu)
    b_ml = b_ml.at[0, LP:LP + L].set(b_lv)

    w_y = jnp.zeros((LP, LANE), jnp.float32)
    w_y = w_y.at[:L, 0].set(w_dec[0])
    w_y = w_y.at[:L, 1].set(w_fair[0, :L])
    w_a = jnp.zeros((1, LANE), jnp.float32)
    w_a = w_a.at[0, 1].set(w_fair[0, L])
    b_y = jnp.zeros((1, LANE), jnp.float32)
    b_y = b_y.at[0, 0].set(b_dec[0])
    b_y = b_y.at[0, 1].set(b_fair[0])

    return dict(w_ml=w_ml, b_ml=b_ml, w_y=w_y, w_a=w_a, b_y=b_y, L=L, LP=LP)


def vae_head_forward(rep, a, eps, packed, *, tile_b=256):
    """Pallas forward of the VAE heads.

    rep : (B, F) float32  pooled ResNet-50 features (F = 2048)
    a   : (B,)   float32  sensitive attribute
    eps : (B, L) float32  uniform reparametrization noise
    returns (yhat (B,1), yhat_fair (B,1), mu (B,L), logvar (B,L))
    """
    B, F = rep.shape
    L, LP = packed["L"], packed["LP"]

    tile_b = _round_up(min(tile_b, _round_up(B, 8)), 8)
    B_pad = _round_up(B, tile_b)
    grid = (B_pad // tile_b,)

    rep_p = jnp.pad(rep.astype(jnp.float32), ((0, B_pad - B), (0, 0)))
    eps_p = jnp.pad(eps.astype(jnp.float32), ((0, B_pad - B), (0, LP - L)))
    a_p = jnp.pad(a.reshape(-1, 1).astype(jnp.float32), ((0, B_pad - B), (0, 0)))

    kernel = functools.partial(_vae_head_kernel, lp=LP)

    ml, y = pl.pallas_call(
        kernel,
        out_shape=(
            jax.ShapeDtypeStruct((B_pad, 2 * LP), jnp.float32),   # [mu | logvar], lane-dense
            jax.ShapeDtypeStruct((B_pad, LANE), jnp.float32),     # [yhat, yhat_fair, 0...]
        ),
        grid=grid,
        in_specs=[
            pl.BlockSpec((tile_b, F), lambda i: (i, 0)),        # rep tile (batch-tiled)
            pl.BlockSpec((tile_b, LP), lambda i: (i, 0)),       # eps tile
            pl.BlockSpec((tile_b, 1), lambda i: (i, 0)),        # a tile
            pl.BlockSpec((F, 2 * LP), lambda i: (0, 0)),        # fused fc1|fc2 weight (VMEM-resident)
            pl.BlockSpec((1, 2 * LP), lambda i: (0, 0)),        # fused fc1|fc2 bias
            pl.BlockSpec((LP, LANE), lambda i: (0, 0)),         # packed decoder/fair-decoder weights
            pl.BlockSpec((1, LANE), lambda i: (0, 0)),          # rank-1 'a' weight row
            pl.BlockSpec((1, LANE), lambda i: (0, 0)),          # packed head biases
        ],
        out_specs=(
            pl.BlockSpec((tile_b, 2 * LP), lambda i: (i, 0)),
            pl.BlockSpec((tile_b, LANE), lambda i: (i, 0)),
        ),
        compiler_params=pltpu.CompilerParams(
            dimension_semantics=("parallel",),
            vmem_limit_bytes=32 * 1024 * 1024,
        ),
    )(rep_p, eps_p, a_p, packed["w_ml"], packed["b_ml"],
      packed["w_y"], packed["w_a"], packed["b_y"])

    mu = ml[:B, :L]
    logvar = ml[:B, LP:LP + L]
    yhat = y[:B, 0:1]
    yhat_fair = y[:B, 1:2]
    return yhat, yhat_fair, mu, logvar


def init_params(latent_dim, feat_dim=2048, seed=0):
    """PyTorch nn.Linear-style init: U(-1/sqrt(fan_in), 1/sqrt(fan_in))."""
    key = jax.random.PRNGKey(seed)
    ks = jax.random.split(key, 8)

    def lin(kw, kb, out_f, in_f):
        bound = 1.0 / jnp.sqrt(jnp.float32(in_f))
        w = jax.random.uniform(kw, (out_f, in_f), jnp.float32, -bound, bound)
        b = jax.random.uniform(kb, (out_f,), jnp.float32, -bound, bound)
        return w, b

    w_mu, b_mu = lin(ks[0], ks[1], latent_dim, feat_dim)        # encoder.fc1
    w_lv, b_lv = lin(ks[2], ks[3], latent_dim, feat_dim)        # encoder.fc2
    w_dec, b_dec = lin(ks[4], ks[5], 1, latent_dim)             # Decoder.onelayer
    w_fair, b_fair = lin(ks[6], ks[7], 1, latent_dim + 1)       # FairDecoder.onelayer
    return (w_mu, b_mu, w_lv, b_lv, w_dec, b_dec, w_fair, b_fair)


if __name__ == "__main__":
    latent_dim = 32
    feat_dim = 2048          # ResNet-50 pooled feature size (512 * 4)
    batch = 8

    key = jax.random.PRNGKey(0)
    k_rep, k_a, k_eps = jax.random.split(key, 3)

    # Stand-in for the (untranslated) ResNet-50 backbone output.
    rep = jax.random.normal(k_rep, (batch, feat_dim), jnp.float32)
    a = (jax.random.uniform(k_a, (batch,)) > 0.5).astype(jnp.float32)
    eps = jax.random.uniform(k_eps, (batch, latent_dim), jnp.float32)  # torch.rand_like

    raw = init_params(latent_dim, feat_dim)
    packed = pack_params(*raw)

    yhat, yhat_fair, mu, logvar = vae_head_forward(rep, a, eps, packed)
    jax.block_until_ready((yhat, yhat_fair, mu, logvar))

    # Pure-JAX reference with identical semantics.
    w_mu, b_mu, w_lv, b_lv, w_dec, b_dec, w_fair, b_fair = raw
    hp = jax.lax.Precision.HIGHEST
    mu_r = jnp.dot(rep, w_mu.T, precision=hp) + b_mu
    lv_r = jnp.dot(rep, w_lv.T, precision=hp) + b_lv
    z_r = mu_r + jnp.exp(0.5 * lv_r) * eps
    yhat_r = jnp.dot(z_r, w_dec.T, precision=hp) + b_dec
    za_r = jnp.concatenate([z_r, a.reshape(-1, 1)], axis=1)
    yfair_r = jnp.dot(za_r, w_fair.T, precision=hp) + b_fair

    assert yhat.shape == (batch, 1) and yhat_fair.shape == (batch, 1)
    assert mu.shape == (batch, latent_dim) and logvar.shape == (batch, latent_dim)
    assert jnp.allclose(mu, mu_r, atol=2e-4, rtol=2e-4)
    assert jnp.allclose(logvar, lv_r, atol=2e-4, rtol=2e-4)
    assert jnp.allclose(yhat, yhat_r, atol=2e-4, rtol=2e-4)
    assert jnp.allclose(yhat_fair, yfair_r, atol=2e-4, rtol=2e-4)

    print("KERNEL_OK")
</pallas_src>

<mosaic_0001>
module attributes {stable_mosaic.version = 11 : i64} {
  func.func @_vae_head_kernel(%arg0: i32, %arg1: memref<8x2048xf32, #tpu.memory_space<vmem>>, %arg2: memref<8x128xf32, #tpu.memory_space<vmem>>, %arg3: memref<8x1xf32, #tpu.memory_space<vmem>>, %arg4: memref<2048x256xf32, #tpu.memory_space<vmem>>, %arg5: memref<1x256xf32, #tpu.memory_space<vmem>>, %arg6: memref<128x128xf32, #tpu.memory_space<vmem>>, %arg7: memref<1x128xf32, #tpu.memory_space<vmem>>, %arg8: memref<1x128xf32, #tpu.memory_space<vmem>>, %arg9: memref<8x256xf32, #tpu.memory_space<vmem>>, %arg10: memref<8x128xf32, #tpu.memory_space<vmem>>) attributes {dimension_semantics = [#tpu.dimension_semantics<parallel>], iteration_bounds = array<i64: 1>, scalar_prefetch = 0 : i64, scratch_operands = 0 : i64, tpu.core_type = #tpu.core_type<tc>, window_params = [{transform_indices = @transform_0, window_bounds = array<i64: 8, 2048>}, {transform_indices = @transform_1, window_bounds = array<i64: 8, 128>}, {transform_indices = @transform_2, window_bounds = array<i64: 8, 1>}, {pipeline_mode = #tpu.pipeline_mode<synchronous>, transform_indices = @transform_3, window_bounds = array<i64: 2048, 256>}, {pipeline_mode = #tpu.pipeline_mode<synchronous>, transform_indices = @transform_4, window_bounds = array<i64: 1, 256>}, {pipeline_mode = #tpu.pipeline_mode<synchronous>, transform_indices = @transform_5, window_bounds = array<i64: 128, 128>}, {pipeline_mode = #tpu.pipeline_mode<synchronous>, transform_indices = @transform_6, window_bounds = array<i64: 1, 128>}, {pipeline_mode = #tpu.pipeline_mode<synchronous>, transform_indices = @transform_7, window_bounds = array<i64: 1, 128>}, {transform_indices = @transform_8, window_bounds = array<i64: 8, 256>}, {transform_indices = @transform_9, window_bounds = array<i64: 8, 128>}]} {
    %c0 = arith.constant 0 : index
    %c0_0 = arith.constant 0 : index
    %0 = vector.load %arg1[%c0, %c0_0] : memref<8x2048xf32, #tpu.memory_space<vmem>>, vector<8x2048xf32>
    %c0_1 = arith.constant 0 : index
    %c0_2 = arith.constant 0 : index
    %1 = vector.load %arg4[%c0_1, %c0_2] : memref<2048x256xf32, #tpu.memory_space<vmem>>, vector<2048x256xf32>
    %cst = arith.constant dense<0.000000e+00> : vector<8x256xf32>
    %2 = tpu.matmul %0, %1, %cst {dimension_numbers = #tpu.dot_dimension_numbers<[1], [0], [0], [1], [0, 0, 1, 1], [], []>} : vector<8x2048xf32>, vector<2048x256xf32>, vector<8x256xf32> -> vector<8x256xf32>
    %c0_3 = arith.constant 0 : index
    %c0_4 = arith.constant 0 : index
    %3 = vector.load %arg5[%c0_3, %c0_4] : memref<1x256xf32, #tpu.memory_space<vmem>>, vector<1x256xf32>
    %4 = vector.broadcast %3 : vector<1x256xf32> to vector<8x256xf32>
    %5 = arith.addf %2, %4 : vector<8x256xf32>
    %6 = vector.extract_strided_slice %5 {offsets = [0, 0], sizes = [8, 128], strides = [1, 1]} : vector<8x256xf32> to vector<8x128xf32>
    %7 = vector.extract_strided_slice %5 {offsets = [0, 128], sizes = [8, 128], strides = [1, 1]} : vector<8x256xf32> to vector<8x128xf32>
    %cst_5 = arith.constant 5.000000e-01 : f32
    %8 = vector.broadcast %cst_5 : f32 to vector<8x128xf32>
    %9 = arith.mulf %8, %7 : vector<8x128xf32>
    %10 = math.exp %9 : vector<8x128xf32>
    %c0_6 = arith.constant 0 : index
    %c0_7 = arith.constant 0 : index
    %11 = vector.load %arg2[%c0_6, %c0_7] : memref<8x128xf32, #tpu.memory_space<vmem>>, vector<8x128xf32>
    %12 = arith.mulf %10, %11 : vector<8x128xf32>
    %13 = arith.addf %6, %12 : vector<8x128xf32>
    %c0_8 = arith.constant 0 : index
    %c0_9 = arith.constant 0 : index
    %14 = vector.load %arg6[%c0_8, %c0_9] : memref<128x128xf32, #tpu.memory_space<vmem>>, vector<128x128xf32>
    %cst_10 = arith.constant dense<0.000000e+00> : vector<8x128xf32>
    %15 = tpu.matmul %13, %14, %cst_10 {dimension_numbers = #tpu.dot_dimension_numbers<[1], [0], [0], [1], [0, 0, 1, 1], [], []>} : vector<8x128xf32>, vector<128x128xf32>, vector<8x128xf32> -> vector<8x128xf32>
    %c0_11 = arith.constant 0 : index
    %c0_12 = arith.constant 0 : index
    %16 = vector.load %arg3[%c0_11, %c0_12] : memref<8x1xf32, #tpu.memory_space<vmem>>, vector<8x1xf32>
    %c0_13 = arith.constant 0 : index
    %c0_14 = arith.constant 0 : index
    %17 = vector.load %arg7[%c0_13, %c0_14] : memref<1x128xf32, #tpu.memory_space<vmem>>, vector<1x128xf32>
    %18 = vector.broadcast %16 : vector<8x1xf32> to vector<8x128xf32>
    %19 = vector.broadcast %17 : vector<1x128xf32> to vector<8x128xf32>
    %20 = arith.mulf %18, %19 : vector<8x128xf32>
    %21 = arith.addf %15, %20 : vector<8x128xf32>
    %c0_15 = arith.constant 0 : index
    %c0_16 = arith.constant 0 : index
    %22 = vector.load %arg8[%c0_15, %c0_16] : memref<1x128xf32, #tpu.memory_space<vmem>>, vector<1x128xf32>
    %23 = vector.broadcast %22 : vector<1x128xf32> to vector<8x128xf32>
    %24 = arith.addf %21, %23 : vector<8x128xf32>
    %c0_17 = arith.constant 0 : index
    %c0_18 = arith.constant 0 : index
    %25 = vector.load %arg9[%c0_17, %c0_18] : memref<8x256xf32, #tpu.memory_space<vmem>>, vector<8x256xf32>
    tpu.vector_store %arg9[%c0_17, %c0_18], %5 {strides = array<i32>} : memref<8x256xf32, #tpu.memory_space<vmem>>, vector<8x256xf32>,
    %c0_19 = arith.constant 0 : index
    %c0_20 = arith.constant 0 : index
    %26 = vector.load %arg10[%c0_19, %c0_20] : memref<8x128xf32, #tpu.memory_space<vmem>>, vector<8x128xf32>
    tpu.vector_store %arg10[%c0_19, %c0_20], %24 {strides = array<i32>} : memref<8x128xf32, #tpu.memory_space<vmem>>, vector<8x128xf32>,
    return
  }
  func.func @transform_0(%arg0: i32) -> (i32, i32) {
    %c0_i32 = arith.constant 0 : i32
    %c0_i32_0 = arith.constant 0 : i32
    return %arg0, %c0_i32 : i32, i32
  }
  func.func @transform_1(%arg0: i32) -> (i32, i32) {
    %c0_i32 = arith.constant 0 : i32
    %c0_i32_0 = arith.constant 0 : i32
    return %arg0, %c0_i32 : i32, i32
  }
  func.func @transform_2(%arg0: i32) -> (i32, i32) {
    %c0_i32 = arith.constant 0 : i32
    %c0_i32_0 = arith.constant 0 : i32
    return %arg0, %c0_i32 : i32, i32
  }
  func.func @transform_3(%arg0: i32) -> (i32, i32) {
    %c0_i32 = arith.constant 0 : i32
    %c0_i32_0 = arith.constant 0 : i32
    %c0_i32_1 = arith.constant 0 : i32
    return %c0_i32, %c0_i32_0 : i32, i32
  }
  func.func @transform_4(%arg0: i32) -> (i32, i32) {
    %c0_i32 = arith.constant 0 : i32
    %c0_i32_0 = arith.constant 0 : i32
    %c0_i32_1 = arith.constant 0 : i32
    return %c0_i32, %c0_i32_0 : i32, i32
  }
  func.func @transform_5(%arg0: i32) -> (i32, i32) {
    %c0_i32 = arith.constant 0 : i32
    %c0_i32_0 = arith.constant 0 : i32
    %c0_i32_1 = arith.constant 0 : i32
    return %c0_i32, %c0_i32_0 : i32, i32
  }
  func.func @transform_6(%arg0: i32) -> (i32, i32) {
    %c0_i32 = arith.constant 0 : i32
    %c0_i32_0 = arith.constant 0 : i32
    %c0_i32_1 = arith.constant 0 : i32
    return %c0_i32, %c0_i32_0 : i32, i32
  }
  func.func @transform_7(%arg0: i32) -> (i32, i32) {
    %c0_i32 = arith.constant 0 : i32
    %c0_i32_0 = arith.constant 0 : i32
    %c0_i32_1 = arith.constant 0 : i32
    return %c0_i32, %c0_i32_0 : i32, i32
  }
  func.func @transform_8(%arg0: i32) -> (i32, i32) {
    %c0_i32 = arith.constant 0 : i32
    %c0_i32_0 = arith.constant 0 : i32
    return %arg0, %c0_i32 : i32, i32
  }
  func.func @transform_9(%arg0: i32) -> (i32, i32) {
    %c0_i32 = arith.constant 0 : i32
    %c0_i32_0 = arith.constant 0 : i32
    return %arg0, %c0_i32 : i32, i32
  }
}

</mosaic_0001>

<bundles_post_ra>
// kernel: tpu_custom_call.1
= control target key start
LH: loop header
LB: loop body
LE: loop exit
PB: predicated region body
PF: predicated region fallthrough
CT: control target
= control target key end

     0   :  { %15 = vsyncpa [#allocation3], 0  ;;  %s1768_s0 = inlined_call_operand.hbm [shape: f32[8,2048], index: 0, kind: input, shape index: {}]   ;;  %s1769_s1 = inlined_call_operand.hbm [shape: f32[8,128], index: 1, kind: input, shape index: {}]   ;;  %s1770_s2 = inlined_call_operand.vmem [shape: f32[8,1], index: 2, kind: input, shape index: {}]   ;;  %s1771_s3 = inlined_call_operand.hbm [shape: f32[2048,256], index: 3, kind: input, shape index: {}]   ;;  %s1772_s4 = inlined_call_operand.hbm [shape: f32[1,256], index: 4, kind: input, shape index: {}]   ;;  %s1773_s5 = inlined_call_operand.hbm [shape: f32[128,128], index: 5, kind: input, shape index: {}]   ;;  %s1774_s6 = inlined_call_operand.hbm [shape: f32[1,128], index: 6, kind: input, shape index: {}]   ;;  %s1775_s7 = inlined_call_operand.hbm [shape: f32[1,128], index: 7, kind: input, shape index: {}]   ;;  %s1776_s8 = inlined_call_operand.hbm [shape: f32[8,256], index: 8, kind: output, shape index: {0}]   ;;  %s1777_s9 = inlined_call_operand.hbm [shape: f32[8,128], index: 9, kind: output, shape index: {1}]  }
   0x1   :  { %16 = vsyncpa [#allocation6], 0 }
   0x2   :  { %17 = vsyncpa [#allocation9], 0 }
   0x3   :  { %18 = vsyncpa [#allocation12], 0 }
   0x4   :  { %19 = vsyncpa [#allocation4], 0  ;;  %s37_s11 = sshll.u32 %s1769_s1, 4  ;;  %s38_s11 = int_to_ptr.hbm [resolvable:$true] %s37_s11 }
   0x5   :  { %20 = vsyncpa [#allocation16], 0  ;;  %s1666_s12 = smov [#allocation5]   ;;  %s63_s16 = sshll.u32 %s1772_s4, 4  ;;  %s64_s16 = int_to_ptr.hbm [resolvable:$true] %s63_s16 }
   0x6   :  { %s39_s13 = sshll.u32 %s1666_s12, 4  ;;  %s1667_s17 = smov [#allocation8]   ;;  %s40_s13 = int_to_ptr.vmem [resolvable:$true] %s39_s13 }
   0x7   :  { %42 = dma.hbm_to_vmem [thread:$0]  %s38_s11, 128, %s40_s13, [#allocation6]  }
   0x8   :  { %s65_s18 = sshll.u32 %s1667_s17, 4  ;;  %s87_s21 = sshll.u32 %s1774_s6, 4  ;;  %s66_s18 = int_to_ptr.vmem [resolvable:$true] %s65_s18  ;;  %s88_s21 = int_to_ptr.hbm [resolvable:$true] %s87_s21 }
   0x9   :  { %68 = dma.hbm_to_vmem [thread:$0]  %s64_s16, 32, %s66_s18, [#allocation9]  }
   0xa   :  { %s26_s23 = sshll.u32 %s1768_s0, 4  ;;  %s1668_s24 = smov [#allocation11]   ;;  %s27_s23 = int_to_ptr.hbm [resolvable:$true] %s26_s23 }
   0xb   :  { %s89_s25 = sshll.u32 %s1668_s24, 4  ;;  %s1669_s4 = smov [#allocation2]   ;;  %s90_s25 = int_to_ptr.vmem [resolvable:$true] %s89_s25 }
   0xc   :  { %92 = dma.hbm_to_vmem [thread:$0]  %s88_s21, 16, %s90_s25, [#allocation12]  }
   0xd   :  { %s28_s26 = sshll.u32 %s1669_s4, 4  ;;  %s49_s29 = sshll.u32 %s1771_s3, 4  ;;  %s29_s26 = int_to_ptr.vmem [resolvable:$true] %s28_s26  ;;  %s50_s29 = int_to_ptr.hbm [resolvable:$true] %s49_s29 }
   0xe   :  { %31 = dma.hbm_to_vmem [thread:$0]  %s27_s23, 2048, %s29_s26, [#allocation3]  }
   0xf   :  { %s1670_s6 = smov [#allocation7]   ;;  %s73_s0 = sshll.u32 %s1773_s5, 4  ;;  %s74_s0 = int_to_ptr.hbm [resolvable:$true] %s73_s0 }
  0x10   :  { %s51_s30 = sshll.u32 %s1670_s6, 4  ;;  %s1671_s12 = smov 256   ;;  %s52_s30 = int_to_ptr.vmem [resolvable:$true] %s51_s30 }
  0x11   :  { %s1672_s13 = smov 16   ;;  %s1673_s14 = smov [#allocation10]  }
  0x12   :  { %57 = dma.hbm_to_vmem [thread:$0]  %s50_s29, 65536, %s52_s30, [#allocation6], %s1671_s12, %s1671_s12, %s1672_s13  }
  0x13   :  { %s75_s15 = sshll.u32 %s1673_s14, 4  ;;  %s1674_s16 = smov 128   ;;  %s76_s15 = int_to_ptr.vmem [resolvable:$true] %s75_s15 }
  0x14   :  { %s1675_s17 = smov 8   ;;  %s98_s19 = sshll.u32 %s1775_s7, 4  ;;  %s99_s19 = int_to_ptr.hbm [resolvable:$true] %s98_s19 }
  0x15   :  { %81 = dma.hbm_to_vmem [thread:$0]  %s74_s0, 2048, %s76_s15, [#allocation9], %s1674_s16, %s1674_s16, %s1675_s17  }
  0x16   :  { %s1676_s20 = smov [#allocation13]  }
  0x17   :  { %s100_s21 = sshll.u32 %s1676_s20, 4  ;;  %s101_s21 = int_to_ptr.vmem [resolvable:$true] %s100_s21 }
  0x18   :  { %103 = dma.hbm_to_vmem [thread:$0]  %s99_s19, 16, %s101_s21, [#allocation12]  }
  0x19   :  { %1654 = dma.done.wait [#allocation3], 2048  }
  0x1a   :  { %1655 = vsyncadd [#allocation3], 4294965248 }
  0x1b   :  { %1656 = dma.done.wait [#allocation6], 65664  }
  0x1c   :  { %1657 = vsyncadd [#allocation6], 4294901632 }
  0x1d   :  { %1658 = dma.done.wait [#allocation9], 2080  }
  0x1e   :  { %1659 = vsyncadd [#allocation9], 4294965216 }
  0x1f   :  { %1660 = dma.done.wait [#allocation12], 32  }
  0x20   :  { %1661 = vsyncadd [#allocation12], 4294967264  ;;  %v178_v0 = vld [vmem:[#allocation7 + $0xf0] sm:$0xff]  ;;  %v176_v2 = vld [vmem:[#allocation7 + $0xe0] sm:$0xff]  ;;  %s1374_s24 = sshll.u32 %s1776_s8, 4  ;;  %s1679_s25 = smov [#allocation15]   ;;  %s1375_s24 = int_to_ptr.hbm [resolvable:$true] %s1374_s24 }
  0x21   :  { %v242_v1 = vld [vmem:[#allocation7 + $0x2f0] sm:$0xff]  ;;  %666 = vmatpush.msra.mxu0 %v178_v0  ;;  %v240_v4 = vld [vmem:[#allocation7 + $0x2e0] sm:$0xff]  ;;  %s1383_s4 = sshll.u32 %s1679_s25, 4  ;;  %s1385_s28 = sshll.u32 %s1777_s9, 4  ;;  %s1384_s4 = int_to_ptr.vmem [resolvable:$true] %s1383_s4  ;;  %s1386_s28 = int_to_ptr.hbm [resolvable:$true] %s1385_s28 }
  0x22   :  { %706 = vmatpush.msra.mxu2 %v242_v1  ;;  %v210_v3 = vld [vmem:[#allocation7 + $0x1f0] sm:$0xff]  ;;  %v208_v7 = vld [vmem:[#allocation7 + $0x1e0] sm:$0xff] }
  0x23   :  { %v274_v5 = vld [vmem:[#allocation7 + $0x3f0] sm:$0xff]  ;;  %686 = vmatpush.msra.mxu1 %v210_v3  ;;  %667 = vmatpush.msra.mxu0 %v176_v2  ;;  %v272_v9 = vld [vmem:[#allocation7 + $0x3e0] sm:$0xff] }
  0x24   :  { %726 = vmatpush.msra.mxu3 %v274_v5  ;;  %v174_v6 = vld [vmem:[#allocation7 + $0xd0] sm:$0xff]  ;;  %707 = vmatpush.msra.mxu2 %v240_v4  ;;  %v172_v11 = vld [vmem:[#allocation7 + $0xc0] sm:$0xff] }
  0x25   :  { %v238_v8 = vld [vmem:[#allocation7 + $0x2d0] sm:$0xff]  ;;  %687 = vmatpush.msra.mxu1 %v208_v7  ;;  %v236_v12 = vld [vmem:[#allocation7 + $0x2c0] sm:$0xff]  ;;  %668 = vmatpush.msra.mxu0 %v174_v6 }
  0x26   :  { %v206_v10 = vld [vmem:[#allocation7 + $0x1d0] sm:$0xff]  ;;  %727 = vmatpush.msra.mxu3 %v272_v9  ;;  %708 = vmatpush.msra.mxu2 %v238_v8  ;;  %v204_v14 = vld [vmem:[#allocation7 + $0x1c0] sm:$0xff] }
  0x27   :  { %v270_v13 = vld [vmem:[#allocation7 + $0x3d0] sm:$0xff]  ;;  %v268_v15 = vld [vmem:[#allocation7 + $0x3c0] sm:$0xff]  ;;  %688 = vmatpush.msra.mxu1 %v206_v10  ;;  %669 = vmatpush.msra.mxu0 %v172_v11 }
  0x28   :  { %728 = vmatpush.msra.mxu3 %v270_v13  ;;  %v170_v16 = vld [vmem:[#allocation7 + $0xb0] sm:$0xff]  ;;  %709 = vmatpush.msra.mxu2 %v236_v12  ;;  %v168_v20 = vld [vmem:[#allocation7 + $0xa0] sm:$0xff] }
  0x29   :  { %v234_v17 = vld [vmem:[#allocation7 + $0x2b0] sm:$0xff]  ;;  %689 = vmatpush.msra.mxu1 %v204_v14  ;;  %v232_v21 = vld [vmem:[#allocation7 + $0x2a0] sm:$0xff]  ;;  %670 = vmatpush.msra.mxu0 %v170_v16 }
  0x2a   :  { %v202_v18 = vld [vmem:[#allocation7 + $0x1b0] sm:$0xff]  ;;  %729 = vmatpush.msra.mxu3 %v268_v15  ;;  %710 = vmatpush.msra.mxu2 %v234_v17  ;;  %v200_v22 = vld [vmem:[#allocation7 + $0x1a0] sm:$0xff] }
  0x2b   :  { %v266_v19 = vld [vmem:[#allocation7 + $0x3b0] sm:$0xff]  ;;  %v264_v23 = vld [vmem:[#allocation7 + $0x3a0] sm:$0xff]  ;;  %690 = vmatpush.msra.mxu1 %v202_v18  ;;  %671 = vmatpush.msra.mxu0 %v168_v20 }
  0x2c   :  { %730 = vmatpush.msra.mxu3 %v266_v19  ;;  %v166_v24 = vld [vmem:[#allocation7 + $0x90] sm:$0xff]  ;;  %711 = vmatpush.msra.mxu2 %v232_v21  ;;  %v164_v28 = vld [vmem:[#allocation7 + $0x80] sm:$0xff] }
  0x2d   :  { %v230_v25 = vld [vmem:[#allocation7 + $0x290] sm:$0xff]  ;;  %691 = vmatpush.msra.mxu1 %v200_v22  ;;  %v228_v29 = vld [vmem:[#allocation7 + $0x280] sm:$0xff]  ;;  %672 = vmatpush.msra.mxu0 %v166_v24 }
  0x2e   :  { %v198_v26 = vld [vmem:[#allocation7 + $0x190] sm:$0xff]  ;;  %731 = vmatpush.msra.mxu3 %v264_v23  ;;  %712 = vmatpush.msra.mxu2 %v230_v25  ;;  %v196_v30 = vld [vmem:[#allocation7 + $0x180] sm:$0xff] }
  0x2f   :  { %v262_v27 = vld [vmem:[#allocation7 + $0x390] sm:$0xff]  ;;  %v260_v31 = vld [vmem:[#allocation7 + $0x380] sm:$0xff]  ;;  %692 = vmatpush.msra.mxu1 %v198_v26  ;;  %673 = vmatpush.msra.mxu0 %v164_v28 }
  0x30   :  { %732 = vmatpush.msra.mxu3 %v262_v27  ;;  %v162_v32 = vld [vmem:[#allocation7 + $0x70] sm:$0xff]  ;;  %713 = vmatpush.msra.mxu2 %v228_v29  ;;  %v160_v36 = vld [vmem:[#allocation7 + $0x60] sm:$0xff] }
  0x31   :  { %v226_v33 = vld [vmem:[#allocation7 + $0x270] sm:$0xff]  ;;  %693 = vmatpush.msra.mxu1 %v196_v30  ;;  %v224_v37 = vld [vmem:[#allocation7 + $0x260] sm:$0xff]  ;;  %674 = vmatpush.msra.mxu0 %v162_v32 }
  0x32   :  { %v194_v34 = vld [vmem:[#allocation7 + $0x170] sm:$0xff]  ;;  %733 = vmatpush.msra.mxu3 %v260_v31  ;;  %714 = vmatpush.msra.mxu2 %v226_v33  ;;  %v192_v38 = vld [vmem:[#allocation7 + $0x160] sm:$0xff] }
  0x33   :  { %v258_v35 = vld [vmem:[#allocation7 + $0x370] sm:$0xff]  ;;  %v256_v39 = vld [vmem:[#allocation7 + $0x360] sm:$0xff]  ;;  %694 = vmatpush.msra.mxu1 %v194_v34  ;;  %675 = vmatpush.msra.mxu0 %v160_v36 }
  0x34   :  { %734 = vmatpush.msra.mxu3 %v258_v35  ;;  %v158_v40 = vld [vmem:[#allocation7 + $0x50] sm:$0xff]  ;;  %715 = vmatpush.msra.mxu2 %v224_v37  ;;  %v156_v44 = vld [vmem:[#allocation7 + $0x40] sm:$0xff] }
  0x35   :  { %v222_v41 = vld [vmem:[#allocation7 + $0x250] sm:$0xff]  ;;  %695 = vmatpush.msra.mxu1 %v192_v38  ;;  %v220_v45 = vld [vmem:[#allocation7 + $0x240] sm:$0xff]  ;;  %676 = vmatpush.msra.mxu0 %v158_v40 }
  0x36   :  { %v190_v42 = vld [vmem:[#allocation7 + $0x150] sm:$0xff]  ;;  %735 = vmatpush.msra.mxu3 %v256_v39  ;;  %716 = vmatpush.msra.mxu2 %v222_v41  ;;  %v188_v46 = vld [vmem:[#allocation7 + $0x140] sm:$0xff] }
  0x37   :  { %v254_v43 = vld [vmem:[#allocation7 + $0x350] sm:$0xff]  ;;  %v252_v47 = vld [vmem:[#allocation7 + $0x340] sm:$0xff]  ;;  %696 = vmatpush.msra.mxu1 %v190_v42  ;;  %677 = vmatpush.msra.mxu0 %v156_v44 }
  0x38   :  { %736 = vmatpush.msra.mxu3 %v254_v43  ;;  %v154_v48 = vld [vmem:[#allocation7 + $0x30] sm:$0xff]  ;;  %717 = vmatpush.msra.mxu2 %v220_v45  ;;  %v152_v52 = vld [vmem:[#allocation7 + $0x20] sm:$0xff] }
  0x39   :  { %v218_v49 = vld [vmem:[#allocation7 + $0x230] sm:$0xff]  ;;  %697 = vmatpush.msra.mxu1 %v188_v46  ;;  %v216_v53 = vld [vmem:[#allocation7 + $0x220] sm:$0xff]  ;;  %678 = vmatpush.msra.mxu0 %v154_v48 }
  0x3a   :  { %v186_v50 = vld [vmem:[#allocation7 + $0x130] sm:$0xff]  ;;  %737 = vmatpush.msra.mxu3 %v252_v47  ;;  %718 = vmatpush.msra.mxu2 %v218_v49  ;;  %v184_v54 = vld [vmem:[#allocation7 + $0x120] sm:$0xff] }
  0x3b   :  { %v250_v51 = vld [vmem:[#allocation7 + $0x330] sm:$0xff]  ;;  %v248_v55 = vld [vmem:[#allocation7 + $0x320] sm:$0xff]  ;;  %698 = vmatpush.msra.mxu1 %v186_v50  ;;  %679 = vmatpush.msra.mxu0 %v152_v52 }
  0x3c   :  { %738 = vmatpush.msra.mxu3 %v250_v51  ;;  %v150_v56 = vld [vmem:[#allocation7 + $0x10] sm:$0xff]  ;;  %719 = vmatpush.msra.mxu2 %v216_v53  ;;  %v148_v60 = vld [vmem:[#allocation7] sm:$0xff] }
  0x3d   :  { %v214_v57 = vld [vmem:[#allocation7 + $0x210] sm:$0xff]  ;;  %699 = vmatpush.msra.mxu1 %v184_v54  ;;  %v212_v61 = vld [vmem:[#allocation7 + $0x200] sm:$0xff]  ;;  %680 = vmatpush.msra.mxu0 %v150_v56 }
  0x3e   :  { %v182_v58 = vld [vmem:[#allocation7 + $0x110] sm:$0xff]  ;;  %739 = vmatpush.msra.mxu3 %v248_v55  ;;  %720 = vmatpush.msra.mxu2 %v214_v57  ;;  %v180_v0 = vld [vmem:[#allocation7 + $0x100] sm:$0xff] }
  0x3f   :  { %v246_v59 = vld [vmem:[#allocation7 + $0x310] sm:$0xff]  ;;  %700 = vmatpush.msra.mxu1 %v182_v58  ;;  %v244_v1 = vld [vmem:[#allocation7 + $0x300] sm:$0xff]  ;;  %681 = vmatpush.msra.mxu0 %v148_v60 }
  0x40   :  { %v306_v62 = vld [vmem:[#allocation7 + $0x4f0] sm:$0xff]  ;;  %740 = vmatpush.msra.mxu3 %v246_v59  ;;  %721 = vmatpush.msra.mxu2 %v212_v61  ;;  %v304_v2 = vld [vmem:[#allocation7 + $0x4e0] sm:$0xff] }
  0x41   :  { %v370_v63 = vld [vmem:[#allocation7 + $0x6f0] sm:$0xff]  ;;  %746 = vmatpush.msrb.mxu0 %v306_v62  ;;  %v368_v4 = vld [vmem:[#allocation7 + $0x6e0] sm:$0xff]  ;;  %701 = vmatpush.msra.mxu1 %v180_v0  ;;  %v132_v62 = vld [vmem:[#allocation2] sm:$0xff] }
  0x42   :  { %v338_v3 = vld [vmem:[#allocation7 + $0x5f0] sm:$0xff]  ;;  %786 = vmatpush.msrb.mxu2 %v370_v63  ;;  %741 = vmatpush.msra.mxu3 %v244_v1  ;;  %v336_v7 = vld [vmem:[#allocation7 + $0x5e0] sm:$0xff]  ;;  %v134_v63 = vld [vmem:[#allocation2 + $0x10] sm:$0xff] }
  0x43   :  { %v402_v5 = vld [vmem:[#allocation7 + $0x7f0] sm:$0xff]  ;;  %747 = vmatpush.msrb.mxu0 %v304_v2  ;;  %766 = vmatpush.msrb.mxu1 %v338_v3  ;;  %v400_v9 = vld [vmem:[#allocation7 + $0x7e0] sm:$0xff] }
  0x44   :  { %v302_v6 = vld [vmem:[#allocation7 + $0x4d0] sm:$0xff]  ;;  %787 = vmatpush.msrb.mxu2 %v368_v4  ;;  %806 = vmatpush.msrb.mxu3 %v402_v5  ;;  %v300_v10 = vld [vmem:[#allocation7 + $0x4c0] sm:$0xff] }
  0x45   :  { %v366_v8 = vld [vmem:[#allocation7 + $0x6d0] sm:$0xff]  ;;  %748 = vmatpush.msrb.mxu0 %v302_v6  ;;  %767 = vmatpush.msrb.mxu1 %v336_v7  ;;  %v364_v12 = vld [vmem:[#allocation7 + $0x6c0] sm:$0xff] }
  0x46   :  { %v334_v11 = vld [vmem:[#allocation7 + $0x5d0] sm:$0xff]  ;;  %788 = vmatpush.msrb.mxu2 %v366_v8  ;;  %807 = vmatpush.msrb.mxu3 %v400_v9  ;;  %v332_v15 = vld [vmem:[#allocation7 + $0x5c0] sm:$0xff] }
  0x47   :  { %v398_v13 = vld [vmem:[#allocation7 + $0x7d0] sm:$0xff]  ;;  %749 = vmatpush.msrb.mxu0 %v300_v10  ;;  %768 = vmatpush.msrb.mxu1 %v334_v11  ;;  %v396_v17 = vld [vmem:[#allocation7 + $0x7c0] sm:$0xff] }
  0x48   :  { %v298_v14 = vld [vmem:[#allocation7 + $0x4b0] sm:$0xff]  ;;  %789 = vmatpush.msrb.mxu2 %v364_v12  ;;  %808 = vmatpush.msrb.mxu3 %v398_v13  ;;  %v296_v18 = vld [vmem:[#allocation7 + $0x4a0] sm:$0xff] }
  0x49   :  { %v362_v16 = vld [vmem:[#allocation7 + $0x6b0] sm:$0xff]  ;;  %750 = vmatpush.msrb.mxu0 %v298_v14  ;;  %769 = vmatpush.msrb.mxu1 %v332_v15  ;;  %v360_v20 = vld [vmem:[#allocation7 + $0x6a0] sm:$0xff] }
  0x4a   :  { %v330_v19 = vld [vmem:[#allocation7 + $0x5b0] sm:$0xff]  ;;  %790 = vmatpush.msrb.mxu2 %v362_v16  ;;  %809 = vmatpush.msrb.mxu3 %v396_v17  ;;  %v328_v23 = vld [vmem:[#allocation7 + $0x5a0] sm:$0xff] }
  0x4b   :  { %v394_v21 = vld [vmem:[#allocation7 + $0x7b0] sm:$0xff]  ;;  %751 = vmatpush.msrb.mxu0 %v296_v18  ;;  %770 = vmatpush.msrb.mxu1 %v330_v19  ;;  %v392_v25 = vld [vmem:[#allocation7 + $0x7a0] sm:$0xff]  ;;  %v138_v18 = vld [vmem:[#allocation2 + $0x30] sm:$0xff] }
  0x4c   :  { %v294_v22 = vld [vmem:[#allocation7 + $0x490] sm:$0xff]  ;;  %791 = vmatpush.msrb.mxu2 %v360_v20  ;;  %810 = vmatpush.msrb.mxu3 %v394_v21  ;;  %v292_v26 = vld [vmem:[#allocation7 + $0x480] sm:$0xff] }
  0x4d   :  { %v358_v24 = vld [vmem:[#allocation7 + $0x690] sm:$0xff]  ;;  %752 = vmatpush.msrb.mxu0 %v294_v22  ;;  %771 = vmatpush.msrb.mxu1 %v328_v23  ;;  %v356_v28 = vld [vmem:[#allocation7 + $0x680] sm:$0xff]  ;;  %v136_v23 = vld [vmem:[#allocation2 + $0x20] sm:$0xff] }
  0x4e   :  { %v326_v27 = vld [vmem:[#allocation7 + $0x590] sm:$0xff]  ;;  %792 = vmatpush.msrb.mxu2 %v358_v24  ;;  %811 = vmatpush.msrb.mxu3 %v392_v25  ;;  %v324_v31 = vld [vmem:[#allocation7 + $0x580] sm:$0xff] }
  0x4f   :  { %v390_v29 = vld [vmem:[#allocation7 + $0x790] sm:$0xff]  ;;  %753 = vmatpush.msrb.mxu0 %v292_v26  ;;  %772 = vmatpush.msrb.mxu1 %v326_v27  ;;  %v388_v33 = vld [vmem:[#allocation7 + $0x780] sm:$0xff] }
  0x50   :  { %v290_v30 = vld [vmem:[#allocation7 + $0x470] sm:$0xff]  ;;  %793 = vmatpush.msrb.mxu2 %v356_v28  ;;  %812 = vmatpush.msrb.mxu3 %v390_v29  ;;  %v288_v34 = vld [vmem:[#allocation7 + $0x460] sm:$0xff] }
  0x51   :  { %v354_v32 = vld [vmem:[#allocation7 + $0x670] sm:$0xff]  ;;  %754 = vmatpush.msrb.mxu0 %v290_v30  ;;  %773 = vmatpush.msrb.mxu1 %v324_v31  ;;  %v352_v36 = vld [vmem:[#allocation7 + $0x660] sm:$0xff] }
  0x52   :  { %v322_v35 = vld [vmem:[#allocation7 + $0x570] sm:$0xff]  ;;  %794 = vmatpush.msrb.mxu2 %v354_v32  ;;  %813 = vmatpush.msrb.mxu3 %v388_v33  ;;  %v320_v39 = vld [vmem:[#allocation7 + $0x560] sm:$0xff] }
  0x53   :  { %v386_v37 = vld [vmem:[#allocation7 + $0x770] sm:$0xff]  ;;  %755 = vmatpush.msrb.mxu0 %v288_v34  ;;  %774 = vmatpush.msrb.mxu1 %v322_v35  ;;  %v384_v41 = vld [vmem:[#allocation7 + $0x760] sm:$0xff] }
  0x54   :  { %v286_v38 = vld [vmem:[#allocation7 + $0x450] sm:$0xff]  ;;  %795 = vmatpush.msrb.mxu2 %v352_v36  ;;  %814 = vmatpush.msrb.mxu3 %v386_v37  ;;  %v284_v42 = vld [vmem:[#allocation7 + $0x440] sm:$0xff] }
  0x55   :  { %v350_v40 = vld [vmem:[#allocation7 + $0x650] sm:$0xff]  ;;  %756 = vmatpush.msrb.mxu0 %v286_v38  ;;  %775 = vmatpush.msrb.mxu1 %v320_v39  ;;  %v348_v44 = vld [vmem:[#allocation7 + $0x640] sm:$0xff] }
  0x56   :  { %v318_v43 = vld [vmem:[#allocation7 + $0x550] sm:$0xff]  ;;  %796 = vmatpush.msrb.mxu2 %v350_v40  ;;  %815 = vmatpush.msrb.mxu3 %v384_v41  ;;  %v316_v47 = vld [vmem:[#allocation7 + $0x540] sm:$0xff] }
  0x57   :  { %v382_v45 = vld [vmem:[#allocation7 + $0x750] sm:$0xff]  ;;  %757 = vmatpush.msrb.mxu0 %v284_v42  ;;  %776 = vmatpush.msrb.mxu1 %v318_v43  ;;  %v380_v49 = vld [vmem:[#allocation7 + $0x740] sm:$0xff] }
  0x58   :  { %v282_v46 = vld [vmem:[#allocation7 + $0x430] sm:$0xff]  ;;  %797 = vmatpush.msrb.mxu2 %v348_v44  ;;  %816 = vmatpush.msrb.mxu3 %v382_v45  ;;  %v280_v50 = vld [vmem:[#allocation7 + $0x420] sm:$0xff] }
  0x59   :  { %v346_v48 = vld [vmem:[#allocation7 + $0x630] sm:$0xff]  ;;  %758 = vmatpush.msrb.mxu0 %v282_v46  ;;  %777 = vmatpush.msrb.mxu1 %v316_v47  ;;  %v344_v52 = vld [vmem:[#allocation7 + $0x620] sm:$0xff] }
  0x5a   :  { %v314_v51 = vld [vmem:[#allocation7 + $0x530] sm:$0xff]  ;;  %798 = vmatpush.msrb.mxu2 %v346_v48  ;;  %817 = vmatpush.msrb.mxu3 %v380_v49  ;;  %v312_v55 = vld [vmem:[#allocation7 + $0x520] sm:$0xff] }
  0x5b   :  { %v378_v53 = vld [vmem:[#allocation7 + $0x730] sm:$0xff]  ;;  %759 = vmatpush.msrb.mxu0 %v280_v50  ;;  %778 = vmatpush.msrb.mxu1 %v314_v51  ;;  %v376_v57 = vld [vmem:[#allocation7 + $0x720] sm:$0xff] }
  0x5c   :  { %v278_v54 = vld [vmem:[#allocation7 + $0x410] sm:$0xff]  ;;  %799 = vmatpush.msrb.mxu2 %v344_v52  ;;  %818 = vmatpush.msrb.mxu3 %v378_v53  ;;  %v276_v58 = vld [vmem:[#allocation7 + $0x400] sm:$0xff] }
  0x5d   :  { %v342_v56 = vld [vmem:[#allocation7 + $0x610] sm:$0xff]  ;;  %760 = vmatpush.msrb.mxu0 %v278_v54  ;;  %779 = vmatpush.msrb.mxu1 %v312_v55  ;;  %v340_v60 = vld [vmem:[#allocation7 + $0x600] sm:$0xff] }
  0x5e   :  { %v310_v59 = vld [vmem:[#allocation7 + $0x510] sm:$0xff]  ;;  %800 = vmatpush.msrb.mxu2 %v342_v56  ;;  %819 = vmatpush.msrb.mxu3 %v376_v57  ;;  %v308_v2 = vld [vmem:[#allocation7 + $0x500] sm:$0xff] }
  0x5f   :  { %v374_v61 = vld [vmem:[#allocation7 + $0x710] sm:$0xff]  ;;  %761 = vmatpush.msrb.mxu0 %v276_v58  ;;  %780 = vmatpush.msrb.mxu1 %v310_v59  ;;  %v372_v3 = vld [vmem:[#allocation7 + $0x700] sm:$0xff] }
  0x60   :  { %v434_v0 = vld [vmem:[#allocation7 + $0x8f0] sm:$0xff]  ;;  %801 = vmatpush.msrb.mxu2 %v340_v60  ;;  %820 = vmatpush.msrb.mxu3 %v374_v61  ;;  %v133_v4 = vld [vmem:[#allocation2 + $0x8] sm:$0xff] }
  0x61   :  { %v498_v1 = vld [vmem:[#allocation7 + $0xaf0] sm:$0xff]  ;;  %682 = vmatmul.f32.vlgmr.msra.gmra.mxu0 %v132_v62  ;;  %722 = vmatmul.f32.vlgmr.msra.gmra.mxu2 %v134_v63  ;;  %v432_v6 = vld [vmem:[#allocation7 + $0x8e0] sm:$0xff] }
  0x62   :  { %v135_v5 = vld [vmem:[#allocation2 + $0x18] sm:$0xff]  ;;  %826 = vmatpush.msra.mxu0 %v434_v0  ;;  %866 = vmatpush.msra.mxu2 %v498_v1  ;;  %v496_v8 = vld [vmem:[#allocation7 + $0xae0] sm:$0xff] }
  0x63   :  { %v466_v7 = vld [vmem:[#allocation7 + $0x9f0] sm:$0xff]  ;;  %781 = vmatpush.msrb.mxu1 %v308_v2  ;;  %821 = vmatpush.msrb.mxu3 %v372_v3  ;;  %v464_v11 = vld [vmem:[#allocation7 + $0x9e0] sm:$0xff] }
  0x64   :  { %v530_v9 = vld [vmem:[#allocation7 + $0xbf0] sm:$0xff]  ;;  %702 = vmatmul.f32.vlgmr.msra.gmra.mxu1 %v133_v4  ;;  %742 = vmatmul.f32.vlgmr.msra.gmra.mxu3 %v135_v5  ;;  %v528_v13 = vld [vmem:[#allocation7 + $0xbe0] sm:$0xff] }
  0x65   :  { %v430_v10 = vld [vmem:[#allocation7 + $0x8d0] sm:$0xff]  ;;  %827 = vmatpush.msra.mxu0 %v432_v6  ;;  %846 = vmatpush.msra.mxu1 %v466_v7  ;;  %v428_v14 = vld [vmem:[#allocation7 + $0x8c0] sm:$0xff]  ;;  %v140_v6 = vld [vmem:[#allocation2 + $0x40] sm:$0xff] }
  0x66   :  { %v494_v12 = vld [vmem:[#allocation7 + $0xad0] sm:$0xff]  ;;  %867 = vmatpush.msra.mxu2 %v496_v8  ;;  %886 = vmatpush.msra.mxu3 %v530_v9  ;;  %v492_v16 = vld [vmem:[#allocation7 + $0xac0] sm:$0xff]  ;;  %v142_v7 = vld [vmem:[#allocation2 + $0x50] sm:$0xff] }
  0x67   :  { %v462_v15 = vld [vmem:[#allocation7 + $0x9d0] sm:$0xff]  ;;  %828 = vmatpush.msra.mxu0 %v430_v10  ;;  %847 = vmatpush.msra.mxu1 %v464_v11  ;;  %v460_v20 = vld [vmem:[#allocation7 + $0x9c0] sm:$0xff] }
  0x68   :  { %v526_v17 = vld [vmem:[#allocation7 + $0xbd0] sm:$0xff]  ;;  %868 = vmatpush.msra.mxu2 %v494_v12  ;;  %887 = vmatpush.msra.mxu3 %v528_v13  ;;  %v524_v22 = vld [vmem:[#allocation7 + $0xbc0] sm:$0xff] }
  0x69   :  { %v426_v19 = vld [vmem:[#allocation7 + $0x8b0] sm:$0xff]  ;;  %829 = vmatpush.msra.mxu0 %v428_v14  ;;  %848 = vmatpush.msra.mxu1 %v462_v15  ;;  %v424_v25 = vld [vmem:[#allocation7 + $0x8a0] sm:$0xff] }
  0x6a   :  { %v490_v21 = vld [vmem:[#allocation7 + $0xab0] sm:$0xff]  ;;  %869 = vmatpush.msra.mxu2 %v492_v16  ;;  %888 = vmatpush.msra.mxu3 %v526_v17  ;;  %v488_v27 = vld [vmem:[#allocation7 + $0xaa0] sm:$0xff] }
  0x6b   :  { %802 = vmatmul.f32.vlgmr.msrb.gmra.mxu2 %v138_v18  ;;  %830 = vmatpush.msra.mxu0 %v426_v19  ;;  %v139_v24 = vld [vmem:[#allocation2 + $0x38] sm:$0xff]  ;;  %v137_v29 = vld [vmem:[#allocation2 + $0x28] sm:$0xff] }
  0x6c   :  { %849 = vmatpush.msra.mxu1 %v460_v20  ;;  %870 = vmatpush.msra.mxu2 %v490_v21  ;;  %v458_v26 = vld [vmem:[#allocation7 + $0x9b0] sm:$0xff]  ;;  %v456_v31 = vld [vmem:[#allocation7 + $0x9a0] sm:$0xff] }
  0x6d   :  { %889 = vmatpush.msra.mxu3 %v524_v22  ;;  %762 = vmatmul.f32.vlgmr.msrb.gmra.mxu0 %v136_v23  ;;  %v522_v28 = vld [vmem:[#allocation7 + $0xbb0] sm:$0xff]  ;;  %v520_v33 = vld [vmem:[#allocation7 + $0xba0] sm:$0xff] }
  0x6e   :  { %822 = vmatmul.f32.vlgmr.msrb.gmra.mxu3 %v139_v24  ;;  %831 = vmatpush.msra.mxu0 %v424_v25  ;;  %v422_v30 = vld [vmem:[#allocation7 + $0x890] sm:$0xff]  ;;  %v420_v34 = vld [vmem:[#allocation7 + $0x880] sm:$0xff] }
  0x6f   :  { %850 = vmatpush.msra.mxu1 %v458_v26  ;;  %871 = vmatpush.msra.mxu2 %v488_v27  ;;  %v486_v32 = vld [vmem:[#allocation7 + $0xa90] sm:$0xff]  ;;  %v484_v36 = vld [vmem:[#allocation7 + $0xa80] sm:$0xff] }
  0x70   :  { %890 = vmatpush.msra.mxu3 %v522_v28  ;;  %782 = vmatmul.f32.vlgmr.msrb.gmra.mxu1 %v137_v29  ;;  %v454_v35 = vld [vmem:[#allocation7 + $0x990] sm:$0xff]  ;;  %v452_v39 = vld [vmem:[#allocation7 + $0x980] sm:$0xff] }
  0x71   :  { %832 = vmatpush.msra.mxu0 %v422_v30  ;;  %851 = vmatpush.msra.mxu1 %v456_v31  ;;  %v518_v37 = vld [vmem:[#allocation7 + $0xb90] sm:$0xff]  ;;  %v516_v41 = vld [vmem:[#allocation7 + $0xb80] sm:$0xff] }
  0x72   :  { %872 = vmatpush.msra.mxu2 %v486_v32  ;;  %891 = vmatpush.msra.mxu3 %v520_v33  ;;  %v418_v38 = vld [vmem:[#allocation7 + $0x870] sm:$0xff]  ;;  %v416_v42 = vld [vmem:[#allocation7 + $0x860] sm:$0xff] }
  0x73   :  { %833 = vmatpush.msra.mxu0 %v420_v34  ;;  %852 = vmatpush.msra.mxu1 %v454_v35  ;;  %v482_v40 = vld [vmem:[#allocation7 + $0xa70] sm:$0xff]  ;;  %v480_v44 = vld [vmem:[#allocation7 + $0xa60] sm:$0xff] }
  0x74   :  { %873 = vmatpush.msra.mxu2 %v484_v36  ;;  %892 = vmatpush.msra.mxu3 %v518_v37  ;;  %v450_v43 = vld [vmem:[#allocation7 + $0x970] sm:$0xff]  ;;  %v448_v47 = vld [vmem:[#allocation7 + $0x960] sm:$0xff] }
  0x75   :  { %834 = vmatpush.msra.mxu0 %v418_v38  ;;  %853 = vmatpush.msra.mxu1 %v452_v39  ;;  %v514_v45 = vld [vmem:[#allocation7 + $0xb70] sm:$0xff]  ;;  %v512_v49 = vld [vmem:[#allocation7 + $0xb60] sm:$0xff] }
  0x76   :  { %874 = vmatpush.msra.mxu2 %v482_v40  ;;  %893 = vmatpush.msra.mxu3 %v516_v41  ;;  %v414_v46 = vld [vmem:[#allocation7 + $0x850] sm:$0xff]  ;;  %v412_v50 = vld [vmem:[#allocation7 + $0x840] sm:$0xff] }
  0x77   :  { %835 = vmatpush.msra.mxu0 %v416_v42  ;;  %854 = vmatpush.msra.mxu1 %v450_v43  ;;  %v478_v48 = vld [vmem:[#allocation7 + $0xa50] sm:$0xff]  ;;  %v476_v52 = vld [vmem:[#allocation7 + $0xa40] sm:$0xff] }
  0x78   :  { %875 = vmatpush.msra.mxu2 %v480_v44  ;;  %894 = vmatpush.msra.mxu3 %v514_v45  ;;  %v446_v51 = vld [vmem:[#allocation7 + $0x950] sm:$0xff]  ;;  %v444_v55 = vld [vmem:[#allocation7 + $0x940] sm:$0xff] }
  0x79   :  { %836 = vmatpush.msra.mxu0 %v414_v46  ;;  %855 = vmatpush.msra.mxu1 %v448_v47  ;;  %v510_v53 = vld [vmem:[#allocation7 + $0xb50] sm:$0xff]  ;;  %v508_v57 = vld [vmem:[#allocation7 + $0xb40] sm:$0xff] }
  0x7a   :  { %876 = vmatpush.msra.mxu2 %v478_v48  ;;  %895 = vmatpush.msra.mxu3 %v512_v49  ;;  %v410_v54 = vld [vmem:[#allocation7 + $0x830] sm:$0xff]  ;;  %v408_v58 = vld [vmem:[#allocation7 + $0x820] sm:$0xff] }
  0x7b   :  { %837 = vmatpush.msra.mxu0 %v412_v50  ;;  %856 = vmatpush.msra.mxu1 %v446_v51  ;;  %v474_v56 = vld [vmem:[#allocation7 + $0xa30] sm:$0xff]  ;;  %v472_v60 = vld [vmem:[#allocation7 + $0xa20] sm:$0xff] }
  0x7c   :  { %877 = vmatpush.msra.mxu2 %v476_v52  ;;  %896 = vmatpush.msra.mxu3 %v510_v53  ;;  %v442_v59 = vld [vmem:[#allocation7 + $0x930] sm:$0xff]  ;;  %v440_v63 = vld [vmem:[#allocation7 + $0x920] sm:$0xff] }
  0x7d   :  { %838 = vmatpush.msra.mxu0 %v410_v54  ;;  %857 = vmatpush.msra.mxu1 %v444_v55  ;;  %v506_v61 = vld [vmem:[#allocation7 + $0xb30] sm:$0xff]  ;;  %v504_v1 = vld [vmem:[#allocation7 + $0xb20] sm:$0xff] }
  0x7e   :  { %878 = vmatpush.msra.mxu2 %v474_v56  ;;  %897 = vmatpush.msra.mxu3 %v508_v57  ;;  %v406_v62 = vld [vmem:[#allocation7 + $0x810] sm:$0xff]  ;;  %v404_v2 = vld [vmem:[#allocation7 + $0x800] sm:$0xff] }
  0x7f   :  { %839 = vmatpush.msra.mxu0 %v408_v58  ;;  %858 = vmatpush.msra.mxu1 %v442_v59  ;;  %v470_v0 = vld [vmem:[#allocation7 + $0xa10] sm:$0xff]  ;;  %v468_v4 = vld [vmem:[#allocation7 + $0xa00] sm:$0xff] }
  0x80   :  { %879 = vmatpush.msra.mxu2 %v472_v60  ;;  %898 = vmatpush.msra.mxu3 %v506_v61  ;;  %v438_v3 = vld [vmem:[#allocation7 + $0x910] sm:$0xff]  ;;  %v436_v10 = vld [vmem:[#allocation7 + $0x900] sm:$0xff] }
  0x81   :  { %840 = vmatpush.msra.mxu0 %v406_v62  ;;  %859 = vmatpush.msra.mxu1 %v440_v63  ;;  %v502_v5 = vld [vmem:[#allocation7 + $0xb10] sm:$0xff]  ;;  %v500_v11 = vld [vmem:[#allocation7 + $0xb00] sm:$0xff] }
  0x82   :  { %880 = vmatpush.msra.mxu2 %v470_v0  ;;  %899 = vmatpush.msra.mxu3 %v504_v1  ;;  %v562_v8 = vld [vmem:[#allocation7 + $0xcf0] sm:$0xff]  ;;  %v141_v12 = vld [vmem:[#allocation2 + $0x48] sm:$0xff] }
  0x83   :  { %841 = vmatpush.msra.mxu0 %v404_v2  ;;  %860 = vmatpush.msra.mxu1 %v438_v3  ;;  %v626_v9 = vld [vmem:[#allocation7 + $0xef0] sm:$0xff]  ;;  %v560_v14 = vld [vmem:[#allocation7 + $0xce0] sm:$0xff] }
  0x84   :  { %881 = vmatpush.msra.mxu2 %v468_v4  ;;  %900 = vmatpush.msra.mxu3 %v502_v5  ;;  %v143_v13 = vld [vmem:[#allocation2 + $0x58] sm:$0xff]  ;;  %v624_v16 = vld [vmem:[#allocation7 + $0xee0] sm:$0xff] }
  0x85   :  { %842 = vmatmul.f32.vlgmr.msra.gmra.mxu0 %v140_v6  ;;  %882 = vmatmul.f32.vlgmr.msra.gmra.mxu2 %v142_v7  ;;  %v594_v15 = vld [vmem:[#allocation7 + $0xdf0] sm:$0xff]  ;;  %v592_v19 = vld [vmem:[#allocation7 + $0xde0] sm:$0xff] }
  0x86   :  { %906 = vmatpush.msrb.mxu0 %v562_v8  ;;  %946 = vmatpush.msrb.mxu2 %v626_v9  ;;  %v658_v17 = vld [vmem:[#allocation7 + $0xff0] sm:$0xff]  ;;  %v656_v21 = vld [vmem:[#allocation7 + $0xfe0] sm:$0xff] }
  0x87   :  { %861 = vmatpush.msra.mxu1 %v436_v10  ;;  %901 = vmatpush.msra.mxu3 %v500_v11  ;;  %v558_v18 = vld [vmem:[#allocation7 + $0xcd0] sm:$0xff]  ;;  %v556_v22 = vld [vmem:[#allocation7 + $0xcc0] sm:$0xff]  ;;  %v144_v10 = vld [vmem:[#allocation2 + $0x60] sm:$0xff] }
  0x88   :  { %862 = vmatmul.f32.vlgmr.msra.gmra.mxu1 %v141_v12  ;;  %902 = vmatmul.f32.vlgmr.msra.gmra.mxu3 %v143_v13  ;;  %v622_v20 = vld [vmem:[#allocation7 + $0xed0] sm:$0xff]  ;;  %v620_v24 = vld [vmem:[#allocation7 + $0xec0] sm:$0xff]  ;;  %v146_v11 = vld [vmem:[#allocation2 + $0x70] sm:$0xff] }
  0x89   :  { %907 = vmatpush.msrb.mxu0 %v560_v14  ;;  %926 = vmatpush.msrb.mxu1 %v594_v15  ;;  %v590_v23 = vld [vmem:[#allocation7 + $0xdd0] sm:$0xff]  ;;  %v588_v27 = vld [vmem:[#allocation7 + $0xdc0] sm:$0xff]  ;;  %v179_v12 = vld [vmem:[#allocation7 + $0xf8] sm:$0xff] }
  0x8a   :  { %947 = vmatpush.msrb.mxu2 %v624_v16  ;;  %966 = vmatpush.msrb.mxu3 %v658_v17  ;;  %v654_v25 = vld [vmem:[#allocation7 + $0xfd0] sm:$0xff]  ;;  %v652_v29 = vld [vmem:[#allocation7 + $0xfc0] sm:$0xff]  ;;  %v243_v13 = vld [vmem:[#allocation7 + $0x2f8] sm:$0xff] }
  0x8b   :  { %908 = vmatpush.msrb.mxu0 %v558_v18  ;;  %927 = vmatpush.msrb.mxu1 %v592_v19  ;;  %v554_v26 = vld [vmem:[#allocation7 + $0xcb0] sm:$0xff]  ;;  %v552_v30 = vld [vmem:[#allocation7 + $0xca0] sm:$0xff]  ;;  %v177_v18 = vld [vmem:[#allocation7 + $0xe8] sm:$0xff] }
  0x8c   :  { %948 = vmatpush.msrb.mxu2 %v622_v20  ;;  %967 = vmatpush.msrb.mxu3 %v656_v21  ;;  %v618_v28 = vld [vmem:[#allocation7 + $0xeb0] sm:$0xff]  ;;  %v616_v32 = vld [vmem:[#allocation7 + $0xea0] sm:$0xff]  ;;  %v211_v19 = vld [vmem:[#allocation7 + $0x1f8] sm:$0xff] }
  0x8d   :  { %909 = vmatpush.msrb.mxu0 %v556_v22  ;;  %928 = vmatpush.msrb.mxu1 %v590_v23  ;;  %v586_v31 = vld [vmem:[#allocation7 + $0xdb0] sm:$0xff]  ;;  %v584_v35 = vld [vmem:[#allocation7 + $0xda0] sm:$0xff]  ;;  %v241_v20 = vld [vmem:[#allocation7 + $0x2e8] sm:$0xff] }
  0x8e   :  { %949 = vmatpush.msrb.mxu2 %v620_v24  ;;  %968 = vmatpush.msrb.mxu3 %v654_v25  ;;  %v650_v33 = vld [vmem:[#allocation7 + $0xfb0] sm:$0xff]  ;;  %v648_v37 = vld [vmem:[#allocation7 + $0xfa0] sm:$0xff]  ;;  %v275_v21 = vld [vmem:[#allocation7 + $0x3f8] sm:$0xff] }
  0x8f   :  { %910 = vmatpush.msrb.mxu0 %v554_v26  ;;  %929 = vmatpush.msrb.mxu1 %v588_v27  ;;  %v550_v34 = vld [vmem:[#allocation7 + $0xc90] sm:$0xff]  ;;  %v548_v38 = vld [vmem:[#allocation7 + $0xc80] sm:$0xff]  ;;  %v175_v22 = vld [vmem:[#allocation7 + $0xd8] sm:$0xff] }
  0x90   :  { %950 = vmatpush.msrb.mxu2 %v618_v28  ;;  %969 = vmatpush.msrb.mxu3 %v652_v29  ;;  %v614_v36 = vld [vmem:[#allocation7 + $0xe90] sm:$0xff]  ;;  %v612_v40 = vld [vmem:[#allocation7 + $0xe80] sm:$0xff]  ;;  %v209_v23 = vld [vmem:[#allocation7 + $0x1e8] sm:$0xff] }
  0x91   :  { %911 = vmatpush.msrb.mxu0 %v552_v30  ;;  %930 = vmatpush.msrb.mxu1 %v586_v31  ;;  %v582_v39 = vld [vmem:[#allocation7 + $0xd90] sm:$0xff]  ;;  %v580_v43 = vld [vmem:[#allocation7 + $0xd80] sm:$0xff]  ;;  %v239_v24 = vld [vmem:[#allocation7 + $0x2d8] sm:$0xff] }
  0x92   :  { %951 = vmatpush.msrb.mxu2 %v616_v32  ;;  %970 = vmatpush.msrb.mxu3 %v650_v33  ;;  %v646_v41 = vld [vmem:[#allocation7 + $0xf90] sm:$0xff]  ;;  %v644_v45 = vld [vmem:[#allocation7 + $0xf80] sm:$0xff]  ;;  %v273_v25 = vld [vmem:[#allocation7 + $0x3e8] sm:$0xff] }
  0x93   :  { %912 = vmatpush.msrb.mxu0 %v550_v34  ;;  %931 = vmatpush.msrb.mxu1 %v584_v35  ;;  %v546_v42 = vld [vmem:[#allocation7 + $0xc70] sm:$0xff]  ;;  %v544_v46 = vld [vmem:[#allocation7 + $0xc60] sm:$0xff]  ;;  %v173_v26 = vld [vmem:[#allocation7 + $0xc8] sm:$0xff] }
  0x94   :  { %952 = vmatpush.msrb.mxu2 %v614_v36  ;;  %971 = vmatpush.msrb.mxu3 %v648_v37  ;;  %v610_v44 = vld [vmem:[#allocation7 + $0xe70] sm:$0xff]  ;;  %v608_v48 = vld [vmem:[#allocation7 + $0xe60] sm:$0xff]  ;;  %v207_v27 = vld [vmem:[#allocation7 + $0x1d8] sm:$0xff] }
  0x95   :  { %913 = vmatpush.msrb.mxu0 %v548_v38  ;;  %932 = vmatpush.msrb.mxu1 %v582_v39  ;;  %v578_v47 = vld [vmem:[#allocation7 + $0xd70] sm:$0xff]  ;;  %v576_v51 = vld [vmem:[#allocation7 + $0xd60] sm:$0xff]  ;;  %v237_v28 = vld [vmem:[#allocation7 + $0x2c8] sm:$0xff] }
  0x96   :  { %953 = vmatpush.msrb.mxu2 %v612_v40  ;;  %972 = vmatpush.msrb.mxu3 %v646_v41  ;;  %v642_v49 = vld [vmem:[#allocation7 + $0xf70] sm:$0xff]  ;;  %v640_v53 = vld [vmem:[#allocation7 + $0xf60] sm:$0xff]  ;;  %v271_v29 = vld [vmem:[#allocation7 + $0x3d8] sm:$0xff] }
  0x97   :  { %914 = vmatpush.msrb.mxu0 %v546_v42  ;;  %933 = vmatpush.msrb.mxu1 %v580_v43  ;;  %v542_v50 = vld [vmem:[#allocation7 + $0xc50] sm:$0xff]  ;;  %v540_v54 = vld [vmem:[#allocation7 + $0xc40] sm:$0xff]  ;;  %v171_v30 = vld [vmem:[#allocation7 + $0xb8] sm:$0xff] }
  0x98   :  { %954 = vmatpush.msrb.mxu2 %v610_v44  ;;  %973 = vmatpush.msrb.mxu3 %v644_v45  ;;  %v606_v52 = vld [vmem:[#allocation7 + $0xe50] sm:$0xff]  ;;  %v604_v56 = vld [vmem:[#allocation7 + $0xe40] sm:$0xff]  ;;  %v205_v31 = vld [vmem:[#allocation7 + $0x1c8] sm:$0xff] }
  0x99   :  { %915 = vmatpush.msrb.mxu0 %v544_v46  ;;  %934 = vmatpush.msrb.mxu1 %v578_v47  ;;  %v574_v55 = vld [vmem:[#allocation7 + $0xd50] sm:$0xff]  ;;  %v572_v59 = vld [vmem:[#allocation7 + $0xd40] sm:$0xff]  ;;  %v235_v32 = vld [vmem:[#allocation7 + $0x2b8] sm:$0xff] }
  0x9a   :  { %955 = vmatpush.msrb.mxu2 %v608_v48  ;;  %974 = vmatpush.msrb.mxu3 %v642_v49  ;;  %v638_v57 = vld [vmem:[#allocation7 + $0xf50] sm:$0xff]  ;;  %v636_v61 = vld [vmem:[#allocation7 + $0xf40] sm:$0xff]  ;;  %v269_v33 = vld [vmem:[#allocation7 + $0x3c8] sm:$0xff] }
  0x9b   :  { %916 = vmatpush.msrb.mxu0 %v542_v50  ;;  %935 = vmatpush.msrb.mxu1 %v576_v51  ;;  %v538_v58 = vld [vmem:[#allocation7 + $0xc30] sm:$0xff]  ;;  %v536_v62 = vld [vmem:[#allocation7 + $0xc20] sm:$0xff]  ;;  %v169_v34 = vld [vmem:[#allocation7 + $0xa8] sm:$0xff] }
  0x9c   :  { %956 = vmatpush.msrb.mxu2 %v606_v52  ;;  %975 = vmatpush.msrb.mxu3 %v640_v53  ;;  %v602_v60 = vld [vmem:[#allocation7 + $0xe30] sm:$0xff]  ;;  %v600_v0 = vld [vmem:[#allocation7 + $0xe20] sm:$0xff]  ;;  %v203_v35 = vld [vmem:[#allocation7 + $0x1b8] sm:$0xff] }
  0x9d   :  { %917 = vmatpush.msrb.mxu0 %v540_v54  ;;  %936 = vmatpush.msrb.mxu1 %v574_v55  ;;  %v570_v63 = vld [vmem:[#allocation7 + $0xd30] sm:$0xff]  ;;  %v568_v3 = vld [vmem:[#allocation7 + $0xd20] sm:$0xff]  ;;  %v233_v36 = vld [vmem:[#allocation7 + $0x2a8] sm:$0xff] }
  0x9e   :  { %957 = vmatpush.msrb.mxu2 %v604_v56  ;;  %976 = vmatpush.msrb.mxu3 %v638_v57  ;;  %v634_v1 = vld [vmem:[#allocation7 + $0xf30] sm:$0xff]  ;;  %v632_v5 = vld [vmem:[#allocation7 + $0xf20] sm:$0xff]  ;;  %v267_v37 = vld [vmem:[#allocation7 + $0x3b8] sm:$0xff] }
  0x9f   :  { %918 = vmatpush.msrb.mxu0 %v538_v58  ;;  %937 = vmatpush.msrb.mxu1 %v572_v59  ;;  %v534_v2 = vld [vmem:[#allocation7 + $0xc10] sm:$0xff]  ;;  %v532_v6 = vld [vmem:[#allocation7 + $0xc00] sm:$0xff]  ;;  %v167_v38 = vld [vmem:[#allocation7 + $0x98] sm:$0xff] }
  0xa0   :  { %958 = vmatpush.msrb.mxu2 %v602_v60  ;;  %977 = vmatpush.msrb.mxu3 %v636_v61  ;;  %v598_v4 = vld [vmem:[#allocation7 + $0xe10] sm:$0xff]  ;;  %v596_v8 = vld [vmem:[#allocation7 + $0xe00] sm:$0xff]  ;;  %v201_v39 = vld [vmem:[#allocation7 + $0x1a8] sm:$0xff] }
  0xa1   :  { %919 = vmatpush.msrb.mxu0 %v536_v62  ;;  %938 = vmatpush.msrb.mxu1 %v570_v63  ;;  %v566_v7 = vld [vmem:[#allocation7 + $0xd10] sm:$0xff]  ;;  %v564_v14 = vld [vmem:[#allocation7 + $0xd00] sm:$0xff]  ;;  %v231_v40 = vld [vmem:[#allocation7 + $0x298] sm:$0xff] }
  0xa2   :  { %959 = vmatpush.msrb.mxu2 %v600_v0  ;;  %978 = vmatpush.msrb.mxu3 %v634_v1  ;;  %v630_v9 = vld [vmem:[#allocation7 + $0xf10] sm:$0xff]  ;;  %v628_v15 = vld [vmem:[#allocation7 + $0xf00] sm:$0xff]  ;;  %v265_v41 = vld [vmem:[#allocation7 + $0x3a8] sm:$0xff] }
  0xa3   :  { %920 = vmatpush.msrb.mxu0 %v534_v2  ;;  %939 = vmatpush.msrb.mxu1 %v568_v3  ;;  %v145_v16 = vld [vmem:[#allocation2 + $0x68] sm:$0xff]  ;;  %v147_v17 = vld [vmem:[#allocation2 + $0x78] sm:$0xff]  ;;  %v165_v42 = vld [vmem:[#allocation7 + $0x88] sm:$0xff] }
  0xa4   :  { %960 = vmatpush.msrb.mxu2 %v598_v4  ;;  %979 = vmatpush.msrb.mxu3 %v632_v5  ;;  %v199_v43 = vld [vmem:[#allocation7 + $0x198] sm:$0xff]  ;;  %v229_v44 = vld [vmem:[#allocation7 + $0x288] sm:$0xff] }
  0xa5   :  { %921 = vmatpush.msrb.mxu0 %v532_v6  ;;  %940 = vmatpush.msrb.mxu1 %v566_v7  ;;  %v263_v45 = vld [vmem:[#allocation7 + $0x398] sm:$0xff]  ;;  %v197_v47 = vld [vmem:[#allocation7 + $0x188] sm:$0xff] }
  0xa6   :  { %961 = vmatpush.msrb.mxu2 %v596_v8  ;;  %980 = vmatpush.msrb.mxu3 %v630_v9  ;;  %v163_v46 = vld [vmem:[#allocation7 + $0x78] sm:$0xff]  ;;  %v261_v49 = vld [vmem:[#allocation7 + $0x388] sm:$0xff] }
  0xa7   :  { %922 = vmatmul.f32.vlgmr.msrb.gmra.mxu0 %v144_v10  ;;  %962 = vmatmul.f32.vlgmr.msrb.gmra.mxu2 %v146_v11  ;;  %v227_v48 = vld [vmem:[#allocation7 + $0x278] sm:$0xff]  ;;  %v161_v50 = vld [vmem:[#allocation7 + $0x68] sm:$0xff] }
  0xa8   :  { %986 = vmatpush.msra.mxu0 %v179_v12  ;;  %1026 = vmatpush.msra.mxu2 %v243_v13  ;;  %v195_v51 = vld [vmem:[#allocation7 + $0x178] sm:$0xff]  ;;  %v225_v52 = vld [vmem:[#allocation7 + $0x268] sm:$0xff] }
  0xa9   :  { %941 = vmatpush.msrb.mxu1 %v564_v14  ;;  %981 = vmatpush.msrb.mxu3 %v628_v15  ;;  %v259_v53 = vld [vmem:[#allocation7 + $0x378] sm:$0xff]  ;;  %v193_v55 = vld [vmem:[#allocation7 + $0x168] sm:$0xff] }
  0xaa   :  { %942 = vmatmul.f32.vlgmr.msrb.gmra.mxu1 %v145_v16  ;;  %982 = vmatmul.f32.vlgmr.msrb.gmra.mxu3 %v147_v17  ;;  %v159_v54 = vld [vmem:[#allocation7 + $0x58] sm:$0xff]  ;;  %v257_v57 = vld [vmem:[#allocation7 + $0x368] sm:$0xff] }
  0xab   :  { %987 = vmatpush.msra.mxu0 %v177_v18  ;;  %1006 = vmatpush.msra.mxu1 %v211_v19  ;;  %v223_v56 = vld [vmem:[#allocation7 + $0x258] sm:$0xff]  ;;  %v157_v58 = vld [vmem:[#allocation7 + $0x48] sm:$0xff] }
  0xac   :  { %1027 = vmatpush.msra.mxu2 %v241_v20  ;;  %1046 = vmatpush.msra.mxu3 %v275_v21  ;;  %v191_v59 = vld [vmem:[#allocation7 + $0x158] sm:$0xff]  ;;  %v221_v60 = vld [vmem:[#allocation7 + $0x248] sm:$0xff] }
  0xad   :  { %988 = vmatpush.msra.mxu0 %v175_v22  ;;  %1007 = vmatpush.msra.mxu1 %v209_v23  ;;  %v255_v61 = vld [vmem:[#allocation7 + $0x358] sm:$0xff]  ;;  %v189_v63 = vld [vmem:[#allocation7 + $0x148] sm:$0xff] }
  0xae   :  { %1028 = vmatpush.msra.mxu2 %v239_v24  ;;  %1047 = vmatpush.msra.mxu3 %v273_v25  ;;  %v155_v62 = vld [vmem:[#allocation7 + $0x38] sm:$0xff]  ;;  %v253_v1 = vld [vmem:[#allocation7 + $0x348] sm:$0xff] }
  0xaf   :  { %989 = vmatpush.msra.mxu0 %v173_v26  ;;  %1008 = vmatpush.msra.mxu1 %v207_v27  ;;  %v219_v0 = vld [vmem:[#allocation7 + $0x238] sm:$0xff]  ;;  %v153_v2 = vld [vmem:[#allocation7 + $0x28] sm:$0xff] }
  0xb0   :  { %1029 = vmatpush.msra.mxu2 %v237_v28  ;;  %1048 = vmatpush.msra.mxu3 %v271_v29  ;;  %v187_v3 = vld [vmem:[#allocation7 + $0x138] sm:$0xff]  ;;  %v217_v4 = vld [vmem:[#allocation7 + $0x228] sm:$0xff] }
  0xb1   :  { %990 = vmatpush.msra.mxu0 %v171_v30  ;;  %1009 = vmatpush.msra.mxu1 %v205_v31  ;;  %v251_v5 = vld [vmem:[#allocation7 + $0x338] sm:$0xff]  ;;  %v185_v7 = vld [vmem:[#allocation7 + $0x128] sm:$0xff] }
  0xb2   :  { %1030 = vmatpush.msra.mxu2 %v235_v32  ;;  %1049 = vmatpush.msra.mxu3 %v269_v33  ;;  %v151_v6 = vld [vmem:[#allocation7 + $0x18] sm:$0xff]  ;;  %v249_v9 = vld [vmem:[#allocation7 + $0x328] sm:$0xff] }
  0xb3   :  { %991 = vmatpush.msra.mxu0 %v169_v34  ;;  %1010 = vmatpush.msra.mxu1 %v203_v35  ;;  %v215_v8 = vld [vmem:[#allocation7 + $0x218] sm:$0xff]  ;;  %v149_v10 = vld [vmem:[#allocation7 + $0x8] sm:$0xff] }
  0xb4   :  { %1031 = vmatpush.msra.mxu2 %v233_v36  ;;  %1050 = vmatpush.msra.mxu3 %v267_v37  ;;  %v183_v11 = vld [vmem:[#allocation7 + $0x118] sm:$0xff]  ;;  %v213_v12 = vld [vmem:[#allocation7 + $0x208] sm:$0xff] }
  0xb5   :  { %992 = vmatpush.msra.mxu0 %v167_v38  ;;  %1011 = vmatpush.msra.mxu1 %v201_v39  ;;  %v247_v13 = vld [vmem:[#allocation7 + $0x318] sm:$0xff]  ;;  %v181_v16 = vld [vmem:[#allocation7 + $0x108] sm:$0xff] }
  0xb6   :  { %1032 = vmatpush.msra.mxu2 %v231_v40  ;;  %1051 = vmatpush.msra.mxu3 %v265_v41  ;;  %v307_v14 = vld [vmem:[#allocation7 + $0x4f8] sm:$0xff]  ;;  %v245_v17 = vld [vmem:[#allocation7 + $0x308] sm:$0xff] }
  0xb7   :  { %993 = vmatpush.msra.mxu0 %v165_v42  ;;  %1012 = vmatpush.msra.mxu1 %v199_v43  ;;  %v371_v15 = vld [vmem:[#allocation7 + $0x6f8] sm:$0xff]  ;;  %v305_v18 = vld [vmem:[#allocation7 + $0x4e8] sm:$0xff] }
  0xb8   :  { %1033 = vmatpush.msra.mxu2 %v229_v44  ;;  %1052 = vmatpush.msra.mxu3 %v263_v45  ;;  %v339_v19 = vld [vmem:[#allocation7 + $0x5f8] sm:$0xff]  ;;  %v369_v20 = vld [vmem:[#allocation7 + $0x6e8] sm:$0xff] }
  0xb9   :  { %994 = vmatpush.msra.mxu0 %v163_v46  ;;  %1013 = vmatpush.msra.mxu1 %v197_v47  ;;  %v403_v21 = vld [vmem:[#allocation7 + $0x7f8] sm:$0xff]  ;;  %v337_v23 = vld [vmem:[#allocation7 + $0x5e8] sm:$0xff] }
  0xba   :  { %1034 = vmatpush.msra.mxu2 %v227_v48  ;;  %1053 = vmatpush.msra.mxu3 %v261_v49  ;;  %v303_v22 = vld [vmem:[#allocation7 + $0x4d8] sm:$0xff]  ;;  %v401_v25 = vld [vmem:[#allocation7 + $0x7e8] sm:$0xff] }
  0xbb   :  { %995 = vmatpush.msra.mxu0 %v161_v50  ;;  %1014 = vmatpush.msra.mxu1 %v195_v51  ;;  %v367_v24 = vld [vmem:[#allocation7 + $0x6d8] sm:$0xff]  ;;  %v301_v26 = vld [vmem:[#allocation7 + $0x4c8] sm:$0xff] }
  0xbc   :  { %1035 = vmatpush.msra.mxu2 %v225_v52  ;;  %1054 = vmatpush.msra.mxu3 %v259_v53  ;;  %v335_v27 = vld [vmem:[#allocation7 + $0x5d8] sm:$0xff]  ;;  %v365_v28 = vld [vmem:[#allocation7 + $0x6c8] sm:$0xff] }
  0xbd   :  { %996 = vmatpush.msra.mxu0 %v159_v54  ;;  %1015 = vmatpush.msra.mxu1 %v193_v55  ;;  %v399_v29 = vld [vmem:[#allocation7 + $0x7d8] sm:$0xff]  ;;  %v333_v31 = vld [vmem:[#allocation7 + $0x5c8] sm:$0xff] }
  0xbe   :  { %1036 = vmatpush.msra.mxu2 %v223_v56  ;;  %1055 = vmatpush.msra.mxu3 %v257_v57  ;;  %v299_v30 = vld [vmem:[#allocation7 + $0x4b8] sm:$0xff]  ;;  %v397_v33 = vld [vmem:[#allocation7 + $0x7c8] sm:$0xff] }
  0xbf   :  { %997 = vmatpush.msra.mxu0 %v157_v58  ;;  %1016 = vmatpush.msra.mxu1 %v191_v59  ;;  %v363_v32 = vld [vmem:[#allocation7 + $0x6b8] sm:$0xff]  ;;  %v297_v34 = vld [vmem:[#allocation7 + $0x4a8] sm:$0xff] }
  0xc0   :  { %1037 = vmatpush.msra.mxu2 %v221_v60  ;;  %1056 = vmatpush.msra.mxu3 %v255_v61  ;;  %v331_v35 = vld [vmem:[#allocation7 + $0x5b8] sm:$0xff]  ;;  %v361_v36 = vld [vmem:[#allocation7 + $0x6a8] sm:$0xff] }
  0xc1   :  { %998 = vmatpush.msra.mxu0 %v155_v62  ;;  %1017 = vmatpush.msra.mxu1 %v189_v63  ;;  %v395_v37 = vld [vmem:[#allocation7 + $0x7b8] sm:$0xff]  ;;  %v329_v39 = vld [vmem:[#allocation7 + $0x5a8] sm:$0xff] }
  0xc2   :  { %1038 = vmatpush.msra.mxu2 %v219_v0  ;;  %1057 = vmatpush.msra.mxu3 %v253_v1  ;;  %v295_v38 = vld [vmem:[#allocation7 + $0x498] sm:$0xff]  ;;  %v393_v41 = vld [vmem:[#allocation7 + $0x7a8] sm:$0xff] }
  0xc3   :  { %999 = vmatpush.msra.mxu0 %v153_v2  ;;  %1018 = vmatpush.msra.mxu1 %v187_v3  ;;  %v359_v40 = vld [vmem:[#allocation7 + $0x698] sm:$0xff]  ;;  %v293_v42 = vld [vmem:[#allocation7 + $0x488] sm:$0xff] }
  0xc4   :  { %1039 = vmatpush.msra.mxu2 %v217_v4  ;;  %1058 = vmatpush.msra.mxu3 %v251_v5  ;;  %v327_v43 = vld [vmem:[#allocation7 + $0x598] sm:$0xff]  ;;  %v357_v44 = vld [vmem:[#allocation7 + $0x688] sm:$0xff] }
  0xc5   :  { %1000 = vmatpush.msra.mxu0 %v151_v6  ;;  %1019 = vmatpush.msra.mxu1 %v185_v7  ;;  %v391_v45 = vld [vmem:[#allocation7 + $0x798] sm:$0xff]  ;;  %v325_v47 = vld [vmem:[#allocation7 + $0x588] sm:$0xff] }
  0xc6   :  { %1040 = vmatpush.msra.mxu2 %v215_v8  ;;  %1059 = vmatpush.msra.mxu3 %v249_v9  ;;  %v291_v46 = vld [vmem:[#allocation7 + $0x478] sm:$0xff]  ;;  %v389_v49 = vld [vmem:[#allocation7 + $0x788] sm:$0xff] }
  0xc7   :  { %1001 = vmatpush.msra.mxu0 %v149_v10  ;;  %1020 = vmatpush.msra.mxu1 %v183_v11  ;;  %v355_v48 = vld [vmem:[#allocation7 + $0x678] sm:$0xff]  ;;  %v289_v50 = vld [vmem:[#allocation7 + $0x468] sm:$0xff] }
  0xc8   :  { %1041 = vmatpush.msra.mxu2 %v213_v12  ;;  %1060 = vmatpush.msra.mxu3 %v247_v13  ;;  %v323_v51 = vld [vmem:[#allocation7 + $0x578] sm:$0xff]  ;;  %v353_v52 = vld [vmem:[#allocation7 + $0x668] sm:$0xff] }
  0xc9   :  { %1066 = vmatpush.msrb.mxu0 %v307_v14  ;;  %1021 = vmatpush.msra.mxu1 %v181_v16  ;;  %v387_v53 = vld [vmem:[#allocation7 + $0x778] sm:$0xff]  ;;  %v321_v55 = vld [vmem:[#allocation7 + $0x568] sm:$0xff] }
  0xca   :  { %1106 = vmatpush.msrb.mxu2 %v371_v15  ;;  %1061 = vmatpush.msra.mxu3 %v245_v17  ;;  %v287_v54 = vld [vmem:[#allocation7 + $0x458] sm:$0xff]  ;;  %v385_v57 = vld [vmem:[#allocation7 + $0x768] sm:$0xff] }
  0xcb   :  { %1067 = vmatpush.msrb.mxu0 %v305_v18  ;;  %1086 = vmatpush.msrb.mxu1 %v339_v19  ;;  %v351_v56 = vld [vmem:[#allocation7 + $0x658] sm:$0xff]  ;;  %v285_v58 = vld [vmem:[#allocation7 + $0x448] sm:$0xff] }
  0xcc   :  { %1107 = vmatpush.msrb.mxu2 %v369_v20  ;;  %1126 = vmatpush.msrb.mxu3 %v403_v21  ;;  %v319_v59 = vld [vmem:[#allocation7 + $0x558] sm:$0xff]  ;;  %v349_v60 = vld [vmem:[#allocation7 + $0x648] sm:$0xff] }
  0xcd   :  { %1068 = vmatpush.msrb.mxu0 %v303_v22  ;;  %1087 = vmatpush.msrb.mxu1 %v337_v23  ;;  %v383_v61 = vld [vmem:[#allocation7 + $0x758] sm:$0xff]  ;;  %v317_v63 = vld [vmem:[#allocation7 + $0x548] sm:$0xff] }
  0xce   :  { %1108 = vmatpush.msrb.mxu2 %v367_v24  ;;  %1127 = vmatpush.msrb.mxu3 %v401_v25  ;;  %v283_v62 = vld [vmem:[#allocation7 + $0x438] sm:$0xff]  ;;  %v381_v1 = vld [vmem:[#allocation7 + $0x748] sm:$0xff]  ;;  %v1424_v24 = vld [vmem:[#allocation2 + $0x8] sm:$0xff] }
  0xcf   :  { %1069 = vmatpush.msrb.mxu0 %v301_v26  ;;  %1088 = vmatpush.msrb.mxu1 %v335_v27  ;;  %v347_v0 = vld [vmem:[#allocation7 + $0x638] sm:$0xff]  ;;  %v281_v2 = vld [vmem:[#allocation7 + $0x428] sm:$0xff]  ;;  %v1425_v25 = vld [vmem:[#allocation2 + $0x18] sm:$0xff] }
  0xd0   :  { %1109 = vmatpush.msrb.mxu2 %v365_v28  ;;  %1128 = vmatpush.msrb.mxu3 %v399_v29  ;;  %v315_v3 = vld [vmem:[#allocation7 + $0x538] sm:$0xff]  ;;  %v345_v4 = vld [vmem:[#allocation7 + $0x628] sm:$0xff] }
  0xd1   :  { %1070 = vmatpush.msrb.mxu0 %v299_v30  ;;  %1089 = vmatpush.msrb.mxu1 %v333_v31  ;;  %v379_v5 = vld [vmem:[#allocation7 + $0x738] sm:$0xff]  ;;  %v313_v7 = vld [vmem:[#allocation7 + $0x528] sm:$0xff] }
  0xd2   :  { %1110 = vmatpush.msrb.mxu2 %v363_v32  ;;  %1129 = vmatpush.msrb.mxu3 %v397_v33  ;;  %v279_v6 = vld [vmem:[#allocation7 + $0x418] sm:$0xff]  ;;  %v377_v9 = vld [vmem:[#allocation7 + $0x728] sm:$0xff] }
  0xd3   :  { %1071 = vmatpush.msrb.mxu0 %v297_v34  ;;  %1090 = vmatpush.msrb.mxu1 %v331_v35  ;;  %v343_v8 = vld [vmem:[#allocation7 + $0x618] sm:$0xff]  ;;  %v277_v10 = vld [vmem:[#allocation7 + $0x408] sm:$0xff] }
  0xd4   :  { %1111 = vmatpush.msrb.mxu2 %v361_v36  ;;  %1130 = vmatpush.msrb.mxu3 %v395_v37  ;;  %v311_v11 = vld [vmem:[#allocation7 + $0x518] sm:$0xff]  ;;  %v341_v12 = vld [vmem:[#allocation7 + $0x608] sm:$0xff] }
  0xd5   :  { %1072 = vmatpush.msrb.mxu0 %v295_v38  ;;  %1091 = vmatpush.msrb.mxu1 %v329_v39  ;;  %v375_v13 = vld [vmem:[#allocation7 + $0x718] sm:$0xff]  ;;  %v309_v16 = vld [vmem:[#allocation7 + $0x508] sm:$0xff] }
  0xd6   :  { %1112 = vmatpush.msrb.mxu2 %v359_v40  ;;  %1131 = vmatpush.msrb.mxu3 %v393_v41  ;;  %v435_v14 = vld [vmem:[#allocation7 + $0x8f8] sm:$0xff]  ;;  %v373_v17 = vld [vmem:[#allocation7 + $0x708] sm:$0xff]  ;;  %v1751_v40 = vld [vmem:[#allocation8] sm:$0x3] }
  0xd7   :  { %1073 = vmatpush.msrb.mxu0 %v293_v42  ;;  %1092 = vmatpush.msrb.mxu1 %v327_v43  ;;  %v499_v15 = vld [vmem:[#allocation7 + $0xaf8] sm:$0xff]  ;;  %v1423_v19 = vld [vmem:[#allocation2 + $0x10] sm:$0xff] }
  0xd8   :  { %1113 = vmatpush.msrb.mxu2 %v357_v44  ;;  %1132 = vmatpush.msrb.mxu3 %v391_v45  ;;  %v1422_v18 = vld [vmem:[#allocation2] sm:$0xff]  ;;  %v433_v20 = vld [vmem:[#allocation7 + $0x8e8] sm:$0xff]  ;;  %v1428_v45 = vld [vmem:[#allocation2 + $0x38] sm:$0xff] }
  0xd9   :  { %1074 = vmatpush.msrb.mxu0 %v291_v46  ;;  %1093 = vmatpush.msrb.mxu1 %v325_v47  ;;  %v467_v21 = vld [vmem:[#allocation7 + $0x9f8] sm:$0xff]  ;;  %v497_v22 = vld [vmem:[#allocation7 + $0xae8] sm:$0xff] }
  0xda   :  { %1114 = vmatpush.msrb.mxu2 %v355_v48  ;;  %1133 = vmatpush.msrb.mxu3 %v389_v49  ;;  %v531_v23 = vld [vmem:[#allocation7 + $0xbf8] sm:$0xff]  ;;  %v465_v27 = vld [vmem:[#allocation7 + $0x9e8] sm:$0xff]  ;;  %v662_v48 = vperm.slane %v1751_v40, 0 }
  0xdb   :  { %1075 = vmatpush.msrb.mxu0 %v289_v50  ;;  %1094 = vmatpush.msrb.mxu1 %v323_v51  ;;  %v431_v26 = vld [vmem:[#allocation7 + $0x8d8] sm:$0xff]  ;;  %v529_v29 = vld [vmem:[#allocation7 + $0xbe8] sm:$0xff] }
  0xdc   :  { %1115 = vmatpush.msrb.mxu2 %v353_v52  ;;  %1134 = vmatpush.msrb.mxu3 %v387_v53  ;;  %v495_v28 = vld [vmem:[#allocation7 + $0xad8] sm:$0xff]  ;;  %v429_v30 = vld [vmem:[#allocation7 + $0x8c8] sm:$0xff]  ;;  %v1429_v52 = vld [vmem:[#allocation2 + $0x28] sm:$0xff] }
  0xdd   :  { %1076 = vmatpush.msrb.mxu0 %v287_v54  ;;  %1095 = vmatpush.msrb.mxu1 %v321_v55  ;;  %v463_v31 = vld [vmem:[#allocation7 + $0x9d8] sm:$0xff]  ;;  %v493_v32 = vld [vmem:[#allocation7 + $0xac8] sm:$0xff] }
  0xde   :  { %1116 = vmatpush.msrb.mxu2 %v351_v56  ;;  %1135 = vmatpush.msrb.mxu3 %v385_v57  ;;  %v527_v33 = vld [vmem:[#allocation7 + $0xbd8] sm:$0xff]  ;;  %v461_v35 = vld [vmem:[#allocation7 + $0x9c8] sm:$0xff]  ;;  %v683_v51 = vpop.f32.mrf.mxu0 }
  0xdf   :  { %1077 = vmatpush.msrb.mxu0 %v285_v58  ;;  %1096 = vmatpush.msrb.mxu1 %v319_v59  ;;  %v427_v34 = vld [vmem:[#allocation7 + $0x8b8] sm:$0xff]  ;;  %v525_v37 = vld [vmem:[#allocation7 + $0xbc8] sm:$0xff]  ;;  %v684_v59 = vadd.f32 %v683_v51, %v662_v48  ;;  %v1432_v48 = vld [vmem:[#allocation2 + $0x48] sm:$0xff] }
  0xe0   :  { %1117 = vmatpush.msrb.mxu2 %v349_v60  ;;  %1136 = vmatpush.msrb.mxu3 %v383_v61  ;;  %v491_v36 = vld [vmem:[#allocation7 + $0xab8] sm:$0xff]  ;;  %v1426_v38 = vld [vmem:[#allocation2 + $0x30] sm:$0xff] }
  0xe1   :  { %1078 = vmatpush.msrb.mxu0 %v283_v62  ;;  %1097 = vmatpush.msrb.mxu1 %v317_v63  ;;  %v425_v39 = vld [vmem:[#allocation7 + $0x8a8] sm:$0xff]  ;;  %v459_v41 = vld [vmem:[#allocation7 + $0x9b8] sm:$0xff]  ;;  %v703_v62 = vpop.f32.mrf.mxu1 }
  0xe2   :  { %1118 = vmatpush.msrb.mxu2 %v347_v0  ;;  %1137 = vmatpush.msrb.mxu3 %v381_v1  ;;  %v489_v42 = vld [vmem:[#allocation7 + $0xaa8] sm:$0xff]  ;;  %v1427_v43 = vld [vmem:[#allocation2 + $0x20] sm:$0xff] }
  0xe3   :  { %1079 = vmatpush.msrb.mxu0 %v281_v2  ;;  %1098 = vmatpush.msrb.mxu1 %v315_v3  ;;  %v523_v44 = vld [vmem:[#allocation7 + $0xbb8] sm:$0xff]  ;;  %v457_v47 = vld [vmem:[#allocation7 + $0x9a8] sm:$0xff] }
  0xe4   :  { %1119 = vmatpush.msrb.mxu2 %v345_v4  ;;  %1138 = vmatpush.msrb.mxu3 %v379_v5  ;;  %v423_v46 = vld [vmem:[#allocation7 + $0x898] sm:$0xff]  ;;  %v521_v50 = vld [vmem:[#allocation7 + $0xba8] sm:$0xff]  ;;  %v704_v5 = vadd.f32 %v703_v62, %v684_v59 }
  0xe5   :  { %1080 = vmatpush.msrb.mxu0 %v279_v6  ;;  %1099 = vmatpush.msrb.mxu1 %v313_v7  ;;  %v487_v49 = vld [vmem:[#allocation7 + $0xa98] sm:$0xff]  ;;  %v421_v53 = vld [vmem:[#allocation7 + $0x888] sm:$0xff] }
  0xe6   :  { %1120 = vmatpush.msrb.mxu2 %v343_v8  ;;  %1139 = vmatpush.msrb.mxu3 %v377_v9  ;;  %v455_v54 = vld [vmem:[#allocation7 + $0x998] sm:$0xff]  ;;  %v485_v55 = vld [vmem:[#allocation7 + $0xa88] sm:$0xff]  ;;  %v723_v8 = vpop.f32.mrf.mxu2 }
  0xe7   :  { %1081 = vmatpush.msrb.mxu0 %v277_v10  ;;  %1100 = vmatpush.msrb.mxu1 %v311_v11  ;;  %v519_v56 = vld [vmem:[#allocation7 + $0xb98] sm:$0xff]  ;;  %v453_v58 = vld [vmem:[#allocation7 + $0x988] sm:$0xff] }
  0xe8   :  { %1121 = vmatpush.msrb.mxu2 %v341_v12  ;;  %1140 = vmatpush.msrb.mxu3 %v375_v13  ;;  %v419_v57 = vld [vmem:[#allocation7 + $0x878] sm:$0xff]  ;;  %v517_v61 = vld [vmem:[#allocation7 + $0xb88] sm:$0xff] }
  0xe9   :  { %1002 = vmatmul.f32.vlgmr.msra.gmra.mxu0 %v1422_v18  ;;  %1042 = vmatmul.f32.vlgmr.msra.gmra.mxu2 %v1423_v19  ;;  %v483_v60 = vld [vmem:[#allocation7 + $0xa78] sm:$0xff]  ;;  %v417_v63 = vld [vmem:[#allocation7 + $0x868] sm:$0xff]  ;;  %v743_v18 = vpop.f32.mrf.mxu3 }
  0xea   :  { %1146 = vmatpush.msra.mxu0 %v435_v14  ;;  %1186 = vmatpush.msra.mxu2 %v499_v15  ;;  %v451_v0 = vld [vmem:[#allocation7 + $0x978] sm:$0xff]  ;;  %v481_v1 = vld [vmem:[#allocation7 + $0xa68] sm:$0xff]  ;;  %v724_v15 = vadd.f32 %v723_v8, %v704_v5 }
  0xeb   :  { %1101 = vmatpush.msrb.mxu1 %v309_v16  ;;  %1141 = vmatpush.msrb.mxu3 %v373_v17  ;;  %v515_v2 = vld [vmem:[#allocation7 + $0xb78] sm:$0xff]  ;;  %v449_v4 = vld [vmem:[#allocation7 + $0x968] sm:$0xff] }
  0xec   :  { %1022 = vmatmul.f32.vlgmr.msra.gmra.mxu1 %v1424_v24  ;;  %1062 = vmatmul.f32.vlgmr.msra.gmra.mxu3 %v1425_v25  ;;  %v415_v3 = vld [vmem:[#allocation7 + $0x858] sm:$0xff]  ;;  %v513_v7 = vld [vmem:[#allocation7 + $0xb68] sm:$0xff]  ;;  %v744_v25 = vadd.f32 %v743_v18, %v724_v15 }
  0xed   :  { %1147 = vmatpush.msra.mxu0 %v433_v20  ;;  %1166 = vmatpush.msra.mxu1 %v467_v21  ;;  %v479_v6 = vld [vmem:[#allocation7 + $0xa58] sm:$0xff]  ;;  %v413_v9 = vld [vmem:[#allocation7 + $0x848] sm:$0xff] }
  0xee   :  { %1187 = vmatpush.msra.mxu2 %v497_v22  ;;  %1206 = vmatpush.msra.mxu3 %v531_v23  ;;  %v447_v10 = vld [vmem:[#allocation7 + $0x958] sm:$0xff]  ;;  %v477_v11 = vld [vmem:[#allocation7 + $0xa48] sm:$0xff] }
  0xef   :  { %1148 = vmatpush.msra.mxu0 %v431_v26  ;;  %1167 = vmatpush.msra.mxu1 %v465_v27  ;;  %v511_v12 = vld [vmem:[#allocation7 + $0xb58] sm:$0xff]  ;;  %v445_v14 = vld [vmem:[#allocation7 + $0x948] sm:$0xff] }
  0xf0   :  { %1188 = vmatpush.msra.mxu2 %v495_v28  ;;  %1207 = vmatpush.msra.mxu3 %v529_v29  ;;  %v411_v13 = vld [vmem:[#allocation7 + $0x838] sm:$0xff]  ;;  %v509_v17 = vld [vmem:[#allocation7 + $0xb48] sm:$0xff]  ;;  %v763_v28 = vpop.f32.mrf.mxu0 }
  0xf1   :  { %1149 = vmatpush.msra.mxu0 %v429_v30  ;;  %1168 = vmatpush.msra.mxu1 %v463_v31  ;;  %v475_v16 = vld [vmem:[#allocation7 + $0xa38] sm:$0xff]  ;;  %v409_v19 = vld [vmem:[#allocation7 + $0x828] sm:$0xff]  ;;  %v823_v59 = vpop.f32.mrf.mxu3 }
  0xf2   :  { %1189 = vmatpush.msra.mxu2 %v493_v32  ;;  %1208 = vmatpush.msra.mxu3 %v527_v33  ;;  %v443_v20 = vld [vmem:[#allocation7 + $0x938] sm:$0xff]  ;;  %v473_v21 = vld [vmem:[#allocation7 + $0xa28] sm:$0xff]  ;;  %v764_v33 = vadd.f32 %v763_v28, %v744_v25 }
  0xf3   :  { %1122 = vmatmul.f32.vlgmr.msrb.gmra.mxu2 %v1426_v38  ;;  %1150 = vmatpush.msra.mxu0 %v427_v34  ;;  %v507_v22 = vld [vmem:[#allocation7 + $0xb38] sm:$0xff]  ;;  %v441_v24 = vld [vmem:[#allocation7 + $0x928] sm:$0xff] }
  0xf4   :  { %1169 = vmatpush.msra.mxu1 %v461_v35  ;;  %1190 = vmatpush.msra.mxu2 %v491_v36  ;;  %v407_v23 = vld [vmem:[#allocation7 + $0x818] sm:$0xff]  ;;  %v505_v27 = vld [vmem:[#allocation7 + $0xb28] sm:$0xff]  ;;  %v783_v36 = vpop.f32.mrf.mxu1 }
  0xf5   :  { %1209 = vmatpush.msra.mxu3 %v525_v37  ;;  %1082 = vmatmul.f32.vlgmr.msrb.gmra.mxu0 %v1427_v43  ;;  %v471_v26 = vld [vmem:[#allocation7 + $0xa18] sm:$0xff]  ;;  %v405_v29 = vld [vmem:[#allocation7 + $0x808] sm:$0xff] }
  0xf6   :  { %1142 = vmatmul.f32.vlgmr.msrb.gmra.mxu3 %v1428_v45  ;;  %1151 = vmatpush.msra.mxu0 %v425_v39  ;;  %v439_v30 = vld [vmem:[#allocation7 + $0x918] sm:$0xff]  ;;  %v469_v31 = vld [vmem:[#allocation7 + $0xa08] sm:$0xff] }
  0xf7   :  { %1170 = vmatpush.msra.mxu1 %v459_v41  ;;  %1191 = vmatpush.msra.mxu2 %v489_v42  ;;  %v503_v32 = vld [vmem:[#allocation7 + $0xb18] sm:$0xff]  ;;  %v437_v37 = vld [vmem:[#allocation7 + $0x908] sm:$0xff] }
  0xf8   :  { %1210 = vmatpush.msra.mxu3 %v523_v44  ;;  %1102 = vmatmul.f32.vlgmr.msrb.gmra.mxu1 %v1429_v52  ;;  %v563_v34 = vld [vmem:[#allocation7 + $0xcf8] sm:$0xff]  ;;  %v501_v38 = vld [vmem:[#allocation7 + $0xb08] sm:$0xff]  ;;  %v784_v44 = vadd.f32 %v783_v36, %v764_v33 }
  0xf9   :  { %1152 = vmatpush.msra.mxu0 %v423_v46  ;;  %1171 = vmatpush.msra.mxu1 %v457_v47  ;;  %v627_v35 = vld [vmem:[#allocation7 + $0xef8] sm:$0xff]  ;;  %v1431_v41 = vld [vmem:[#allocation2 + $0x50] sm:$0xff]  ;;  %v803_v47 = vpop.f32.mrf.mxu2 }
  0xfa   :  { %1192 = vmatpush.msra.mxu2 %v487_v49  ;;  %1211 = vmatpush.msra.mxu3 %v521_v50  ;;  %v1430_v39 = vld [vmem:[#allocation2 + $0x40] sm:$0xff]  ;;  %v561_v42 = vld [vmem:[#allocation7 + $0xce8] sm:$0xff]  ;;  %v1433_v49 = vld [vmem:[#allocation2 + $0x58] sm:$0xff] }
  0xfb   :  { %1153 = vmatpush.msra.mxu0 %v421_v53  ;;  %1172 = vmatpush.msra.mxu1 %v455_v54  ;;  %v595_v43 = vld [vmem:[#allocation7 + $0xdf8] sm:$0xff]  ;;  %v625_v45 = vld [vmem:[#allocation7 + $0xee8] sm:$0xff] }
  0xfc   :  { %1193 = vmatpush.msra.mxu2 %v485_v55  ;;  %1212 = vmatpush.msra.mxu3 %v519_v56  ;;  %v659_v46 = vld [vmem:[#allocation7 + $0xff8] sm:$0xff]  ;;  %v593_v51 = vld [vmem:[#allocation7 + $0xde8] sm:$0xff]  ;;  %v804_v56 = vadd.f32 %v803_v47, %v784_v44 }
  0xfd   :  { %1154 = vmatpush.msra.mxu0 %v419_v57  ;;  %1173 = vmatpush.msra.mxu1 %v453_v58  ;;  %v559_v50 = vld [vmem:[#allocation7 + $0xcd8] sm:$0xff]  ;;  %v657_v53 = vld [vmem:[#allocation7 + $0xfe8] sm:$0xff] }
  0xfe   :  { %1194 = vmatpush.msra.mxu2 %v483_v60  ;;  %1213 = vmatpush.msra.mxu3 %v517_v61  ;;  %v623_v52 = vld [vmem:[#allocation7 + $0xed8] sm:$0xff]  ;;  %v557_v54 = vld [vmem:[#allocation7 + $0xcc8] sm:$0xff] }
  0xff   :  { %1155 = vmatpush.msra.mxu0 %v417_v63  ;;  %1174 = vmatpush.msra.mxu1 %v451_v0  ;;  %v591_v55 = vld [vmem:[#allocation7 + $0xdd8] sm:$0xff]  ;;  %v621_v57 = vld [vmem:[#allocation7 + $0xec8] sm:$0xff] }
 0x100   :  { %1195 = vmatpush.msra.mxu2 %v481_v1  ;;  %1214 = vmatpush.msra.mxu3 %v515_v2  ;;  %v655_v58 = vld [vmem:[#allocation7 + $0xfd8] sm:$0xff]  ;;  %v589_v61 = vld [vmem:[#allocation7 + $0xdc8] sm:$0xff] }
 0x101   :  { %1156 = vmatpush.msra.mxu0 %v415_v3  ;;  %1175 = vmatpush.msra.mxu1 %v449_v4  ;;  %v555_v60 = vld [vmem:[#allocation7 + $0xcb8] sm:$0xff]  ;;  %v653_v63 = vld [vmem:[#allocation7 + $0xfc8] sm:$0xff]  ;;  %v824_v3 = vadd.f32 %v823_v59, %v804_v56 }
 0x102   :  { %1196 = vmatpush.msra.mxu2 %v479_v6  ;;  %1215 = vmatpush.msra.mxu3 %v513_v7  ;;  %v619_v62 = vld [vmem:[#allocation7 + $0xeb8] sm:$0xff]  ;;  %v843_v0 = vpop.f32.mrf.mxu0  ;;  %v553_v1 = vld [vmem:[#allocation7 + $0xca8] sm:$0xff] }
 0x103   :  { %1157 = vmatpush.msra.mxu0 %v413_v9  ;;  %1176 = vmatpush.msra.mxu1 %v447_v10  ;;  %v587_v2 = vld [vmem:[#allocation7 + $0xdb8] sm:$0xff]  ;;  %v617_v4 = vld [vmem:[#allocation7 + $0xea8] sm:$0xff]  ;;  %v844_v8 = vadd.f32 %v843_v0, %v824_v3  ;;  %v1437_v3 = vld [vmem:[#allocation2 + $0x78] sm:$0xff] }
 0x104   :  { %1197 = vmatpush.msra.mxu2 %v477_v11  ;;  %1216 = vmatpush.msra.mxu3 %v511_v12  ;;  %v651_v5 = vld [vmem:[#allocation7 + $0xfb8] sm:$0xff]  ;;  %v585_v7 = vld [vmem:[#allocation7 + $0xda8] sm:$0xff] }
 0x105   :  { %1158 = vmatpush.msra.mxu0 %v411_v13  ;;  %1177 = vmatpush.msra.mxu1 %v445_v14  ;;  %v551_v6 = vld [vmem:[#allocation7 + $0xc98] sm:$0xff]  ;;  %v649_v10 = vld [vmem:[#allocation7 + $0xfa8] sm:$0xff]  ;;  %v863_v11 = vpop.f32.mrf.mxu1 }
 0x106   :  { %1198 = vmatpush.msra.mxu2 %v475_v16  ;;  %1217 = vmatpush.msra.mxu3 %v509_v17  ;;  %v615_v9 = vld [vmem:[#allocation7 + $0xe98] sm:$0xff]  ;;  %v549_v12 = vld [vmem:[#allocation7 + $0xc88] sm:$0xff] }
 0x107   :  { %1159 = vmatpush.msra.mxu0 %v409_v19  ;;  %1178 = vmatpush.msra.mxu1 %v443_v20  ;;  %v583_v13 = vld [vmem:[#allocation7 + $0xd98] sm:$0xff]  ;;  %v613_v14 = vld [vmem:[#allocation7 + $0xe88] sm:$0xff]  ;;  %v864_v19 = vadd.f32 %v863_v11, %v844_v8 }
 0x108   :  { %1199 = vmatpush.msra.mxu2 %v473_v21  ;;  %1218 = vmatpush.msra.mxu3 %v507_v22  ;;  %v647_v15 = vld [vmem:[#allocation7 + $0xf98] sm:$0xff]  ;;  %v883_v16 = vpop.f32.mrf.mxu2  ;;  %v581_v18 = vld [vmem:[#allocation7 + $0xd88] sm:$0xff] }
 0x109   :  { %1160 = vmatpush.msra.mxu0 %v407_v23  ;;  %1179 = vmatpush.msra.mxu1 %v441_v24  ;;  %v547_v17 = vld [vmem:[#allocation7 + $0xc78] sm:$0xff]  ;;  %v645_v21 = vld [vmem:[#allocation7 + $0xf88] sm:$0xff]  ;;  %v884_v24 = vadd.f32 %v883_v16, %v864_v19 }
 0x10a   :  { %1200 = vmatpush.msra.mxu2 %v471_v26  ;;  %1219 = vmatpush.msra.mxu3 %v505_v27  ;;  %v611_v20 = vld [vmem:[#allocation7 + $0xe78] sm:$0xff]  ;;  %v545_v22 = vld [vmem:[#allocation7 + $0xc68] sm:$0xff] }
 0x10b   :  { %1161 = vmatpush.msra.mxu0 %v405_v29  ;;  %1180 = vmatpush.msra.mxu1 %v439_v30  ;;  %v579_v23 = vld [vmem:[#allocation7 + $0xd78] sm:$0xff]  ;;  %v609_v25 = vld [vmem:[#allocation7 + $0xe68] sm:$0xff]  ;;  %v903_v27 = vpop.f32.mrf.mxu3 }
 0x10c   :  { %1201 = vmatpush.msra.mxu2 %v469_v31  ;;  %1220 = vmatpush.msra.mxu3 %v503_v32  ;;  %v643_v26 = vld [vmem:[#allocation7 + $0xf78] sm:$0xff]  ;;  %v577_v29 = vld [vmem:[#allocation7 + $0xd68] sm:$0xff] }
 0x10d   :  { %1162 = vmatmul.f32.vlgmr.msra.gmra.mxu0 %v1430_v39  ;;  %1202 = vmatmul.f32.vlgmr.msra.gmra.mxu2 %v1431_v41  ;;  %v543_v28 = vld [vmem:[#allocation7 + $0xc58] sm:$0xff]  ;;  %v641_v31 = vld [vmem:[#allocation7 + $0xf68] sm:$0xff] }
 0x10e   :  { %1226 = vmatpush.msrb.mxu0 %v563_v34  ;;  %1266 = vmatpush.msrb.mxu2 %v627_v35  ;;  %v607_v30 = vld [vmem:[#allocation7 + $0xe58] sm:$0xff]  ;;  %v541_v32 = vld [vmem:[#allocation7 + $0xc48] sm:$0xff]  ;;  %v904_v34 = vadd.f32 %v903_v27, %v884_v24 }
 0x10f   :  { %1181 = vmatpush.msra.mxu1 %v437_v37  ;;  %1221 = vmatpush.msra.mxu3 %v501_v38  ;;  %v575_v33 = vld [vmem:[#allocation7 + $0xd58] sm:$0xff]  ;;  %v605_v35 = vld [vmem:[#allocation7 + $0xe48] sm:$0xff] }
 0x110   :  { %1182 = vmatmul.f32.vlgmr.msra.gmra.mxu1 %v1432_v48  ;;  %1222 = vmatmul.f32.vlgmr.msra.gmra.mxu3 %v1433_v49  ;;  %v639_v36 = vld [vmem:[#allocation7 + $0xf58] sm:$0xff]  ;;  %v573_v38 = vld [vmem:[#allocation7 + $0xd48] sm:$0xff] }
 0x111   :  { %1227 = vmatpush.msrb.mxu0 %v561_v42  ;;  %1246 = vmatpush.msrb.mxu1 %v595_v43  ;;  %v539_v37 = vld [vmem:[#allocation7 + $0xc38] sm:$0xff]  ;;  %v637_v42 = vld [vmem:[#allocation7 + $0xf48] sm:$0xff] }
 0x112   :  { %1267 = vmatpush.msrb.mxu2 %v625_v45  ;;  %1286 = vmatpush.msrb.mxu3 %v659_v46  ;;  %v603_v41 = vld [vmem:[#allocation7 + $0xe38] sm:$0xff]  ;;  %v537_v44 = vld [vmem:[#allocation7 + $0xc28] sm:$0xff] }
 0x113   :  { %1228 = vmatpush.msrb.mxu0 %v559_v50  ;;  %1247 = vmatpush.msrb.mxu1 %v593_v51  ;;  %v571_v45 = vld [vmem:[#allocation7 + $0xd38] sm:$0xff]  ;;  %v601_v46 = vld [vmem:[#allocation7 + $0xe28] sm:$0xff] }
 0x114   :  { %1268 = vmatpush.msrb.mxu2 %v623_v52  ;;  %1287 = vmatpush.msrb.mxu3 %v657_v53  ;;  %v635_v47 = vld [vmem:[#allocation7 + $0xf38] sm:$0xff]  ;;  %v569_v50 = vld [vmem:[#allocation7 + $0xd28] sm:$0xff] }
 0x115   :  { %1229 = vmatpush.msrb.mxu0 %v557_v54  ;;  %1248 = vmatpush.msrb.mxu1 %v591_v55  ;;  %v535_v49 = vld [vmem:[#allocation7 + $0xc18] sm:$0xff]  ;;  %v633_v52 = vld [vmem:[#allocation7 + $0xf28] sm:$0xff] }
 0x116   :  { %1269 = vmatpush.msrb.mxu2 %v621_v57  ;;  %1288 = vmatpush.msrb.mxu3 %v655_v58  ;;  %v599_v51 = vld [vmem:[#allocation7 + $0xe18] sm:$0xff]  ;;  %v533_v54 = vld [vmem:[#allocation7 + $0xc08] sm:$0xff] }
 0x117   :  { %1230 = vmatpush.msrb.mxu0 %v555_v60  ;;  %1249 = vmatpush.msrb.mxu1 %v589_v61  ;;  %v567_v55 = vld [vmem:[#allocation7 + $0xd18] sm:$0xff]  ;;  %v597_v57 = vld [vmem:[#allocation7 + $0xe08] sm:$0xff] }
 0x118   :  { %1270 = vmatpush.msrb.mxu2 %v619_v62  ;;  %1289 = vmatpush.msrb.mxu3 %v653_v63  ;;  %v631_v58 = vld [vmem:[#allocation7 + $0xf18] sm:$0xff]  ;;  %v565_v60 = vld [vmem:[#allocation7 + $0xd08] sm:$0xff] }
 0x119   :  { %1231 = vmatpush.msrb.mxu0 %v553_v1  ;;  %1250 = vmatpush.msrb.mxu1 %v587_v2  ;;  %v629_v61 = vld [vmem:[#allocation7 + $0xf08] sm:$0xff]  ;;  %v1434_v0 = vld [vmem:[#allocation2 + $0x60] sm:$0xff]  ;;  %v1436_v2 = vld [vmem:[#allocation2 + $0x68] sm:$0xff] }
 0x11a   :  { %1271 = vmatpush.msrb.mxu2 %v617_v4  ;;  %1290 = vmatpush.msrb.mxu3 %v651_v5  ;;  %v1435_v1 = vld [vmem:[#allocation2 + $0x70] sm:$0xff]  ;;  %v1327_v4 = vld [vmem:[#allocation10 + $0x78] sm:$0xff]  ;;  %v1326_v5 = vld [vmem:[#allocation10 + $0x70] sm:$0xff] }
 0x11b   :  { %1232 = vmatpush.msrb.mxu0 %v551_v6  ;;  %1251 = vmatpush.msrb.mxu1 %v585_v7  ;;  %v1325_v6 = vld [vmem:[#allocation10 + $0x68] sm:$0xff]  ;;  %v663_v7 = vperm.slane %v1751_v40, 1  ;;  %v1323_v16 = vld [vmem:[#allocation10 + $0x58] sm:$0xff]  ;;  %v1320_v40 = vld [vmem:[#allocation10 + $0x40] sm:$0xff] }
 0x11c   :  { %1272 = vmatpush.msrb.mxu2 %v615_v9  ;;  %1291 = vmatpush.msrb.mxu3 %v649_v10  ;;  %v1317_v27 = vld [vmem:[#allocation10 + $0x28] sm:$0xff] }
 0x11d   :  { %1233 = vmatpush.msrb.mxu0 %v549_v12  ;;  %1252 = vmatpush.msrb.mxu1 %v583_v13 }
 0x11e   :  { %1273 = vmatpush.msrb.mxu2 %v613_v14  ;;  %1292 = vmatpush.msrb.mxu3 %v647_v15  ;;  %v1324_v15 = vld [vmem:[#allocation10 + $0x60] sm:$0xff] }
 0x11f   :  { %1234 = vmatpush.msrb.mxu0 %v547_v17  ;;  %1253 = vmatpush.msrb.mxu1 %v581_v18  ;;  %v1322_v18 = vld [vmem:[#allocation10 + $0x50] sm:$0xff] }
 0x120   :  { %1274 = vmatpush.msrb.mxu2 %v611_v20  ;;  %1293 = vmatpush.msrb.mxu3 %v645_v21  ;;  %v1321_v20 = vld [vmem:[#allocation10 + $0x48] sm:$0xff] }
 0x121   :  { %1235 = vmatpush.msrb.mxu0 %v545_v22  ;;  %1254 = vmatpush.msrb.mxu1 %v579_v23  ;;  %v1319_v23 = vld [vmem:[#allocation10 + $0x38] sm:$0xff] }
 0x122   :  { %1275 = vmatpush.msrb.mxu2 %v609_v25  ;;  %1294 = vmatpush.msrb.mxu3 %v643_v26  ;;  %v1318_v26 = vld [vmem:[#allocation10 + $0x30] sm:$0xff] }
 0x123   :  { %1236 = vmatpush.msrb.mxu0 %v543_v28  ;;  %1255 = vmatpush.msrb.mxu1 %v577_v29  ;;  %v1316_v29 = vld [vmem:[#allocation10 + $0x20] sm:$0xff] }
 0x124   :  { %1276 = vmatpush.msrb.mxu2 %v607_v30  ;;  %1295 = vmatpush.msrb.mxu3 %v641_v31  ;;  %v923_v39 = vpop.f32.mrf.mxu0  ;;  %v1315_v31 = vld [vmem:[#allocation10 + $0x18] sm:$0xff] }
 0x125   :  { %1237 = vmatpush.msrb.mxu0 %v541_v32  ;;  %1256 = vmatpush.msrb.mxu1 %v575_v33  ;;  %v924_v43 = vadd.f32 %v923_v39, %v904_v34  ;;  %v1314_v33 = vld [vmem:[#allocation10 + $0x10] sm:$0xff] }
 0x126   :  { %1277 = vmatpush.msrb.mxu2 %v605_v35  ;;  %1296 = vmatpush.msrb.mxu3 %v639_v36  ;;  %v1313_v35 = vld [vmem:[#allocation10 + $0x8] sm:$0xff] }
 0x127   :  { %1238 = vmatpush.msrb.mxu0 %v539_v37  ;;  %1257 = vmatpush.msrb.mxu1 %v573_v38  ;;  %v943_v48 = vpop.f32.mrf.mxu1  ;;  %v1312_v38 = vld [vmem:[#allocation10] sm:$0xff] }
 0x128   :  { %1278 = vmatpush.msrb.mxu2 %v603_v41  ;;  %1297 = vmatpush.msrb.mxu3 %v637_v42  ;;  %v944_v53 = vadd.f32 %v943_v48, %v924_v43  ;;  %v1328_v42 = vld [vmem:[%s1770_s2] sm:$0xff]  ;;  %s1678_s2 = smov [#allocation14]  }
 0x129   :  { %1239 = vmatpush.msrb.mxu0 %v537_v44  ;;  %1258 = vmatpush.msrb.mxu1 %v571_v45  ;;  %v1677_v44 = vmov 0   ;;  %s1372_s1 = sshll.u32 %s1678_s2, 4  ;;  %s1373_s1 = int_to_ptr.vmem [resolvable:$true] %s1372_s1 }
 0x12a   :  { %1279 = vmatpush.msrb.mxu2 %v601_v46  ;;  %1298 = vmatpush.msrb.mxu3 %v635_v47  ;;  %v963_v56 = vpop.f32.mrf.mxu2 }
 0x12b   :  { %1240 = vmatpush.msrb.mxu0 %v535_v49  ;;  %1259 = vmatpush.msrb.mxu1 %v569_v50  ;;  %v964_v59 = vadd.f32 %v963_v56, %v944_v53 }
 0x12c   :  { %1280 = vmatpush.msrb.mxu2 %v599_v51  ;;  %1299 = vmatpush.msrb.mxu3 %v633_v52 }
 0x12d   :  { %1241 = vmatpush.msrb.mxu0 %v533_v54  ;;  %1260 = vmatpush.msrb.mxu1 %v567_v55  ;;  %v983_v62 = vpop.f32.mrf.mxu3 }
 0x12e   :  { %1281 = vmatpush.msrb.mxu2 %v597_v57  ;;  %1300 = vmatpush.msrb.mxu3 %v631_v58  ;;  %v1754_v63 = vadd.f32 %v983_v62, %v964_v59  ;;  %v1309_v57 = vld [vmem:[#allocation5] sm:$0xff] }
 0x12f   :  { %1242 = vmatmul.f32.vlgmr.msrb.gmra.mxu0 %v1434_v0  ;;  %1282 = vmatmul.f32.vlgmr.msrb.gmra.mxu2 %v1435_v1  ;;  %v1419_v1 = vld [vmem:[#allocation13] ss:$0 sm:$0xff] }
 0x130   :  { %1261 = vmatpush.msrb.mxu1 %v565_v60  ;;  %1301 = vmatpush.msrb.mxu3 %v629_v61  ;;  %1364 = vst [vmem:[#allocation14] sm:$0xff] %v1754_v63  ;;  %v1418_v61 = vld [vmem:[#allocation11] ss:$0 sm:$0xff] }
 0x131   :  { %1262 = vmatmul.f32.vlgmr.msrb.gmra.mxu1 %v1436_v2  ;;  %1302 = vmatmul.f32.vlgmr.msrb.gmra.mxu3 %v1437_v3 }
 0x132   :  { %1339 = vmatpush.msra.mxu0 %v1327_v4  ;;  %1417 = vset.pattern.permute.xlu0 %v1677_v44 }
 0x133   :  { %1332 = vperm.xlu0 %1417, %v1328_v42  }
 0x134   :  { %1340 = vmatpush.msra.mxu0 %v1326_v5 }
 0x136   :  { %1341 = vmatpush.msra.mxu0 %v1325_v6 }
 0x138   :  { %1342 = vmatpush.msra.mxu0 %v1324_v15 }
 0x13a   :  { %1343 = vmatpush.msra.mxu0 %v1323_v16 }
 0x13c   :  { %1344 = vmatpush.msra.mxu0 %v1322_v18 }
 0x13e   :  { %1345 = vmatpush.msra.mxu0 %v1321_v20 }
 0x140   :  { %1346 = vmatpush.msra.mxu0 %v1320_v40 }
 0x142   :  { %1347 = vmatpush.msra.mxu0 %v1319_v23 }
 0x144   :  { %1348 = vmatpush.msra.mxu0 %v1318_v26 }
 0x146   :  { %1349 = vmatpush.msra.mxu0 %v1317_v27 }
 0x148   :  { %1350 = vmatpush.msra.mxu0 %v1316_v29 }
 0x14a   :  { %1351 = vmatpush.msra.mxu0 %v1315_v31 }
 0x14c   :  { %1352 = vmatpush.msra.mxu0 %v1314_v33 }
 0x14e   :  { %1353 = vmatpush.msra.mxu0 %v1313_v35 }
 0x150   :  { %1354 = vmatpush.msra.mxu0 %v1312_v38 }
 0x166   :  { %v1003_v8 = vpop.f32.mrf.mxu0 }
 0x167   :  { %v1004_v9 = vadd.f32 %v1003_v8, %v663_v7 }
 0x169   :  { %v1023_v10 = vpop.f32.mrf.mxu1 }
 0x16a   :  { %v1024_v11 = vadd.f32 %v1023_v10, %v1004_v9 }
 0x16c   :  { %v1043_v12 = vpop.f32.mrf.mxu2 }
 0x16d   :  { %v1044_v13 = vadd.f32 %v1043_v12, %v1024_v11 }
 0x16f   :  { %v1063_v14 = vpop.f32.mrf.mxu3 }
 0x170   :  { %v1064_v17 = vadd.f32 %v1063_v14, %v1044_v13 }
 0x172   :  { %v1083_v19 = vpop.f32.mrf.mxu0 }
 0x173   :  { %v1084_v21 = vadd.f32 %v1083_v19, %v1064_v17 }
 0x175   :  { %v1103_v22 = vpop.f32.mrf.mxu1 }
 0x176   :  { %v1104_v24 = vadd.f32 %v1103_v22, %v1084_v21  ;;  %v1123_v25 = vpop.f32.mrf.mxu2 }
 0x178   :  { %v1124_v28 = vadd.f32 %v1123_v25, %v1104_v24 }
 0x179   :  { %v1143_v30 = vpop.f32.mrf.mxu3 }
 0x17a   :  { %v1144_v34 = vadd.f32 %v1143_v30, %v1124_v28 }
 0x18a   :  { %v1163_v32 = vpop.f32.mrf.mxu0 }
 0x18b   :  { %v1164_v36 = vadd.f32 %v1163_v32, %v1144_v34 }
 0x18d   :  { %v1183_v37 = vpop.f32.mrf.mxu1 }
 0x18e   :  { %v1184_v41 = vadd.f32 %v1183_v37, %v1164_v36 }
 0x190   :  { %v1203_v39 = vpop.f32.mrf.mxu2 }
 0x191   :  { %v1204_v43 = vadd.f32 %v1203_v39, %v1184_v41 }
 0x193   :  { %v1223_v45 = vpop.f32.mrf.mxu3 }
 0x194   :  { %v1224_v46 = vadd.f32 %v1223_v45, %v1204_v43 }
 0x1a5   :  { %v1333_v62 = vpop.permute.xlu0 %1332 }
 0x1a6   :  { %v1338_v0 = vmul.f32 %v1418_v61, %v1333_v62 }
 0x1ac   :  { %v1243_v47 = vpop.f32.mrf.mxu0 }
 0x1ad   :  { %v1244_v48 = vadd.f32 %v1243_v47, %v1224_v46 }
 0x1ae   :  { %v1263_v49 = vpop.f32.mrf.mxu1 }
 0x1af   :  { %v1264_v50 = vadd.f32 %v1263_v49, %v1244_v48 }
 0x1b2   :  { %v1283_v51 = vpop.f32.mrf.mxu2 }
 0x1b3   :  { %v1284_v52 = vadd.f32 %v1283_v51, %v1264_v50 }
 0x1b4   :  { %v1303_v53 = vpop.f32.mrf.mxu3 }
 0x1b5   :  { %v1304_v54 = vadd.f32 %v1303_v53, %v1284_v52 }
 0x1b7   :  { %v1306_v55 = vmul.f32 0.5, %v1304_v54  ;;  %1365 = vst [vmem:[#allocation14 + $0x8] sm:$0xff] %v1304_v54 }
 0x1b8   :  { %1377 = dma.vmem_to_hbm [thread:$0]  %s1373_s1, 256, %s1375_s24, [#allocation4]  }
 0x1b9   :  { %v1307_v56 = vmul.f32 1.442695, %v1306_v55 }
 0x1bb   :  { %1420 = vpow2.f32 %v1307_v56 }
 0x1c1   :  { %v1421_v58 = vpop.eup %1420 }
 0x1c2   :  { %v1310_v59 = vmul.f32 %v1421_v58, %v1309_v57 }
 0x1c4   :  { %v1311_v60 = vadd.f32 %v1310_v59, %v1754_v63 }
 0x1c6   :  { %1355 = vmatmul.f32.vlgmr.msra.gmra.mxu0 %v1311_v60 }
 0x243   :  { %v1356_v2 = vpop.f32.mrf.mxu0 }
 0x244   :  { %v1357_v63 = vadd.f32 %v1356_v2, %v1338_v0 }
 0x246   :  { %v1363_v3 = vadd.f32 %v1419_v1, %v1357_v63 }
 0x248   :  { %1366 = vst [vmem:[#allocation15] sm:$0xff] %v1363_v3 }
 0x249   :  { %1388 = dma.vmem_to_hbm [thread:$0]  %s1384_s4, 128, %s1386_s28, [#allocation16]  }
 0x24a   :  { %1662 = dma.done.wait [#allocation4], 256  }
 0x24b   :  { %1663 = vsyncadd [#allocation4], 4294967040 }
 0x24c   :  { %1664 = dma.done.wait [#allocation16], 128  }
 0x24d   :  { %1665 = vsyncadd [#allocation16], 4294967168 }
 0x24e   :  { %1397 = vsyncpa [#allocation3], 1 }
 0x24f   :  { %1398 = vsyncpa [#allocation6], 1 }
 0x250   :  { %1399 = vsyncpa [#allocation9], 1 }
 0x251   :  { %1400 = vsyncpa [#allocation12], 1 }
 0x252   :  { %1401 = vsyncpa [#allocation4], 1 }
 0x253   :  { %1402 = vsyncpa [#allocation16], 1 }

</bundles_post_ra>
